<compile_context>
chip_gen: v6e
topology: v6e:2x2x1
jax: 0.10.0
libtpu: 0.0.40
codegen_flags: <defaults>
</compile_context>

<pallas_src>
import functools

import jax
import jax.numpy as jnp
from jax.experimental import pallas as pl
from jax.experimental.pallas import tpu as pltpu

EPS = 1e-5


# --------------------------------- kernel ------------------------------------

def _residual_kernel(x_ref, wt1_ref, wt2_ref, g1_ref, b1_ref, g2_ref, b2_ref,
                     out_ref, *, num_channels, height):
    """out = relu(bn2(conv2(relu(bn1(conv1(x))))) + x), all in VMEM.

    Layout: activations are (N*H, W*C) with lane index = w*C + c (lane-dense,
    W*C = 128).  Conv weights arrive as per-tap block-diagonal (9, W*C, W*C)
    bf16 matrices; a 3x3 'SAME' conv is nine bf16 matmuls accumulated in f32.
    """
    NH, WC = x_ref.shape
    C = num_channels
    H = height
    W = WC // C
    inv_cnt = 1.0 / float(NH * W)

    # Tiny hoisted halo masks (broadcast inside jnp.where).
    row = jax.lax.broadcasted_iota(jnp.int32, (NH, 1), dimension=0)
    h_in_img = row % H
    top_row = h_in_img == 0                       # h == 0
    bot_row = h_in_img == (H - 1)                 # h == H-1
    lane = jax.lax.broadcasted_iota(jnp.int32, (1, WC), dimension=1)
    left_edge = lane < C                          # w == 0
    right_edge = lane >= (W - 1) * C              # w == W-1

    def shift2d(a2, s_h, s_w):
        """a2 shifted so out[n,h,w] = a[n, h+s_h, w+s_w], zero at the halo."""
        v = a2
        if s_h != 0:
            # Sublane roll; rows that wrapped (across images too) get masked.
            v = pltpu.roll(v, shift=(-s_h) % NH, axis=0)
        if s_w != 0:
            # Lane roll by one w-group; wrapped edge lanes get masked.
            v = pltpu.roll(v, shift=(-s_w * C) % WC, axis=1)
        mask = None
        if s_h == 1:
            mask = bot_row
        elif s_h == -1:
            mask = top_row
        if s_w == 1:
            mask = right_edge if mask is None else jnp.logical_or(mask, right_edge)
        elif s_w == -1:
            mask = left_edge if mask is None else jnp.logical_or(mask, left_edge)
        if mask is not None:
            v = jnp.where(mask, 0.0, v)
        return v

    def conv3x3(a2, w_ref):
        """3x3 conv, stride 1, padding 1: nine bf16 per-tap matmuls, f32 acc."""
        acc = jnp.zeros((NH, WC), jnp.float32)
        t = 0
        for dh in range(3):
            for dw in range(3):
                s = shift2d(a2, dh - 1, dw - 1).astype(jnp.bfloat16)
                acc = acc + jnp.dot(s, w_ref[t],
                                    preferred_element_type=jnp.float32)
                t += 1
        return acc

    def wsum_bcast(v):
        """(1, WC): sum over w-groups per channel, broadcast back to all lanes.

        log2(W) lane-roll doubling (XLU); requires W to be a power of two.
        """
        step = C
        while step < WC:
            v = v + pltpu.roll(v, shift=step, axis=1)
            step *= 2
        return v

    def bn_train(y, gamma_lane, beta_lane):
        """BatchNorm2d (training-mode batch stats), folded to y*scale + shift."""
        sum_y = jnp.sum(y, axis=0, keepdims=True)            # (1, WC)
        sum_y2 = jnp.sum(y * y, axis=0, keepdims=True)        # (1, WC)
        mean = wsum_bcast(sum_y) * inv_cnt
        ex2 = wsum_bcast(sum_y2) * inv_cnt
        var = jnp.maximum(ex2 - mean * mean, 0.0)             # single-pass var
        scale = gamma_lane * jax.lax.rsqrt(var + EPS)         # rsqrt -> EUP
        shift = beta_lane - mean * scale
        return y * scale + shift

    x2 = x_ref[...]                                           # (NH, WC) f32

    # Stage 1: Y = relu(bn1(conv1(X)))   (conv bias cancels under batch BN)
    y = conv3x3(x2, wt1_ref)
    y = jnp.maximum(bn_train(y, g1_ref[...], b1_ref[...]), 0.0)

    # Stage 2: out = relu(bn2(conv2(Y)) + X)
    y2 = conv3x3(y, wt2_ref)
    y2 = bn_train(y2, g2_ref[...], b2_ref[...])
    out_ref[...] = jnp.maximum(y2 + x2, 0.0)


# ------------------------------ param preprocessing ---------------------------

def _expand_conv_taps(w_hwio, width):
    """(3,3,Ci,Co) HWIO -> (9, W*Ci, W*Co) bf16 per-tap block-diagonal weights.

    For tap t = dh*3+dw: row w'*Ci+ci, col w*Co+co has w_hwio[dh,dw,ci,co]
    iff w' == w, so the lane-dense (NH, W*Ci) activation @ tap gives the
    per-tap conv contribution directly in the (NH, W*Co) lane layout.
    """
    kh, kw, ci, co = w_hwio.shape
    taps = w_hwio.reshape(kh * kw, ci, co).astype(jnp.float32)
    eye = jnp.eye(width, dtype=jnp.float32)
    bd = jnp.einsum('xy,tio->txiyo', eye, taps)               # (9, W, Ci, W, Co)
    return bd.reshape(kh * kw, width * ci, width * co).astype(jnp.bfloat16)


def prepare_residual_params(params, width):
    """Parameter-only preprocessing — call ONCE, outside the per-step hot path."""
    w1, b1, g1, be1, w2, b2, g2, be2 = params
    del b1, b2  # conv biases cancel exactly under training-mode BatchNorm
    ci, co = w1.shape[2], w1.shape[3]
    if ci != co:
        raise NotImplementedError(
            "use_1x1conv / channel-changing shortcut path not implemented")
    if width & (width - 1):
        raise NotImplementedError("width must be a power of two (roll-reduce BN)")
    C = co
    wt1 = _expand_conv_taps(w1, width)                        # (9, W*C, W*C) bf16
    wt2 = _expand_conv_taps(w2, width)

    def lane_tile(p):
        return jnp.tile(jnp.asarray(p, jnp.float32).reshape(1, C), (1, width))

    return (wt1, wt2, lane_tile(g1), lane_tile(be1), lane_tile(g2), lane_tile(be2))


# --------------------------------- wrapper -----------------------------------

@jax.jit
def residual_forward(x_nchw, prepared):
    """Pallas Residual.forward (use_1x1conv=False, stride=1), NCHW in/out."""
    wt1, wt2, g1l, be1l, g2l, be2l = prepared

    x = jnp.transpose(x_nchw, (0, 2, 3, 1)).astype(jnp.float32)  # NCHW -> NHWC
    N, H, W, C = x.shape
    WC = W * C
    x2 = x.reshape(N * H, WC)                                    # lane-dense

    vmem = pl.BlockSpec(memory_space=pltpu.MemorySpace.VMEM)
    kernel = functools.partial(_residual_kernel, num_channels=C, height=H)

    out2 = pl.pallas_call(
        kernel,
        out_shape=jax.ShapeDtypeStruct((N * H, WC), jnp.float32),
        in_specs=[vmem] * 7,
        out_specs=vmem,
        compiler_params=pltpu.CompilerParams(vmem_limit_bytes=32 * 1024 * 1024),
    )(x2, wt1, wt2, g1l, be1l, g2l, be2l)

    out = out2.reshape(N, H, W, C)
    return jnp.transpose(out, (0, 3, 1, 2))                      # NHWC -> NCHW


# ------------------------------ pure-JAX reference ----------------------------

def residual_reference(x_nchw, params):
    w1, b1, g1, be1, w2, b2, g2, be2 = params
    x = jnp.transpose(x_nchw, (0, 2, 3, 1)).astype(jnp.float32)
    dn = ('NHWC', 'HWIO', 'NHWC')

    def conv(z, w, b):
        y = jax.lax.conv_general_dilated(
            z, w, window_strides=(1, 1), padding='SAME',
            dimension_numbers=dn, precision=jax.lax.Precision.HIGHEST)
        return y + b.reshape(1, 1, 1, -1)

    def bn(z, g, be):
        m = jnp.mean(z, axis=(0, 1, 2), keepdims=True)
        v = jnp.mean(jnp.square(z - m), axis=(0, 1, 2), keepdims=True)
        return (z - m) / jnp.sqrt(v + EPS) * g.reshape(1, 1, 1, -1) + be.reshape(1, 1, 1, -1)

    y = jax.nn.relu(bn(conv(x, w1, b1), g1, be1))
    y = bn(conv(y, w2, b2), g2, be2)
    y = jax.nn.relu(y + x)
    return jnp.transpose(y, (0, 3, 1, 2))


# ----------------------------------- main ------------------------------------

if __name__ == "__main__":
    key = jax.random.PRNGKey(0)
    N, C, H, W = 2, 8, 16, 16     # input_channels == num_channels == 8; W*C = 128

    k_x, k_w1, k_b1, k_w2, k_b2 = jax.random.split(key, 5)
    x = jax.random.normal(k_x, (N, C, H, W), dtype=jnp.float32)

    # Deterministic synthetic parameters (PyTorch BN init: gamma=1, beta=0).
    w1 = 0.1 * jax.random.normal(k_w1, (3, 3, C, C), dtype=jnp.float32)   # HWIO
    b1 = 0.05 * jax.random.normal(k_b1, (1, C), dtype=jnp.float32)
    g1 = jnp.ones((1, C), jnp.float32)
    be1 = jnp.zeros((1, C), jnp.float32)
    w2 = 0.1 * jax.random.normal(k_w2, (3, 3, C, C), dtype=jnp.float32)
    b2 = 0.05 * jax.random.normal(k_b2, (1, C), dtype=jnp.float32)
    g2 = jnp.ones((1, C), jnp.float32)
    be2 = jnp.zeros((1, C), jnp.float32)

    params = (w1, b1, g1, be1, w2, b2, g2, be2)

    # One-time parameter preprocessing (hoisted out of the per-step hot path).
    prepared = jax.tree_util.tree_map(jax.block_until_ready,
                                      prepare_residual_params(params, W))

    out = jax.block_until_ready(residual_forward(x, prepared))
    ref = jax.block_until_ready(residual_reference(x, params))

    assert out.shape == (N, C, H, W), out.shape
    assert bool(jnp.all(jnp.isfinite(out)))
    # Tolerance accounts for bf16 MXU operands (f32 accumulation) vs the
    # Precision.HIGHEST f32 reference.
    assert bool(jnp.allclose(out, ref, rtol=2e-2, atol=5e-2)), (
        "mismatch vs reference: max abs diff = "
        f"{float(jnp.max(jnp.abs(out - ref)))}")

    print("KERNEL_OK")
</pallas_src>

<mosaic_0001>
module attributes {stable_mosaic.version = 11 : i64} {
  func.func @_residual_kernel(%arg0: memref<32x128xf32, #tpu.memory_space<vmem>>, %arg1: memref<9x128x128xbf16, #tpu.memory_space<vmem>>, %arg2: memref<9x128x128xbf16, #tpu.memory_space<vmem>>, %arg3: memref<1x128xf32, #tpu.memory_space<vmem>>, %arg4: memref<1x128xf32, #tpu.memory_space<vmem>>, %arg5: memref<1x128xf32, #tpu.memory_space<vmem>>, %arg6: memref<1x128xf32, #tpu.memory_space<vmem>>, %arg7: memref<32x128xf32, #tpu.memory_space<vmem>>) attributes {dimension_semantics = [], scalar_prefetch = 0 : i64, scratch_operands = 0 : i64, tpu.core_type = #tpu.core_type<tc>} {
    %0 = tpu.iota {dimensions = array<i32: 0>} : vector<32x1xi32>
    %c16_i32 = arith.constant 16 : i32
    %c0_i32 = arith.constant 0 : i32
    %1 = arith.cmpi eq, %c16_i32, %c0_i32 : i32
    %c1_i32 = arith.constant 1 : i32
    %2 = arith.select %1, %c1_i32, %c16_i32 : i32
    %3 = vector.broadcast %2 : i32 to vector<32x1xi32>
    %4 = arith.remsi %0, %3 : vector<32x1xi32>
    %c0_i32_0 = arith.constant 0 : i32
    %5 = vector.broadcast %c0_i32_0 : i32 to vector<32x1xi32>
    %6 = arith.cmpi ne, %4, %5 : vector<32x1xi32>
    %c0_i32_1 = arith.constant 0 : i32
    %7 = vector.broadcast %c0_i32_1 : i32 to vector<32x1xi32>
    %8 = arith.cmpi slt, %4, %7 : vector<32x1xi32>
    %c0_i32_2 = arith.constant 0 : i32
    %9 = arith.cmpi slt, %2, %c0_i32_2 : i32
    %10 = vector.broadcast %9 : i1 to vector<32x1xi1>
    %11 = vector.broadcast %10 : vector<32x1xi1> to vector<32x1xi1>
    %12 = arith.xori %8, %11 : vector<32x1xi1>
    %13 = arith.andi %12, %6 : vector<32x1xi1>
    %14 = vector.broadcast %2 : i32 to vector<32x1xi32>
    %15 = arith.addi %4, %14 : vector<32x1xi32>
    %16 = arith.select %13, %15, %4 : vector<32x1xi1>, vector<32x1xi32>
    %c0_i32_3 = arith.constant 0 : i32
    %17 = vector.broadcast %c0_i32_3 : i32 to vector<32x1xi32>
    %18 = arith.cmpi eq, %16, %17 : vector<32x1xi32>
    %c15_i32 = arith.constant 15 : i32
    %19 = vector.broadcast %c15_i32 : i32 to vector<32x1xi32>
    %20 = arith.cmpi eq, %16, %19 : vector<32x1xi32>
    %21 = tpu.iota {dimensions = array<i32: 1>} : vector<1x128xi32>
    %c8_i32 = arith.constant 8 : i32
    %22 = vector.broadcast %c8_i32 : i32 to vector<1x128xi32>
    %23 = arith.cmpi slt, %21, %22 : vector<1x128xi32>
    %c120_i32 = arith.constant 120 : i32
    %24 = vector.broadcast %c120_i32 : i32 to vector<1x128xi32>
    %25 = arith.cmpi sge, %21, %24 : vector<1x128xi32>
    %c0 = arith.constant 0 : index
    %c0_4 = arith.constant 0 : index
    %26 = vector.load %arg0[%c0, %c0_4] : memref<32x128xf32, #tpu.memory_space<vmem>>, vector<32x128xf32>
    %cst = arith.constant 0.000000e+00 : f32
    %27 = vector.broadcast %cst : f32 to vector<32x128xf32>
    %c1_i32_5 = arith.constant 1 : i32
    %28 = tpu.dynamic_rotate %26 by %c1_i32_5 dim 0 : vector<32x128xf32>, i32 -> vector<32x128xf32>
    %c8_i32_6 = arith.constant 8 : i32
    %29 = tpu.dynamic_rotate %28 by %c8_i32_6 dim 1 : vector<32x128xf32>, i32 -> vector<32x128xf32>
    %30 = vector.broadcast %18 : vector<32x1xi1> to vector<32x128xi1>
    %31 = vector.broadcast %23 : vector<1x128xi1> to vector<32x128xi1>
    %32 = arith.ori %30, %31 : vector<32x128xi1>
    %cst_7 = arith.constant 0.000000e+00 : f32
    %33 = vector.broadcast %cst_7 : f32 to vector<32x128xf32>
    %34 = arith.select %32, %33, %29 : vector<32x128xi1>, vector<32x128xf32>
    %35 = arith.truncf %34 : vector<32x128xf32> to vector<32x128xbf16>
    %c0_8 = arith.constant 0 : index
    %c0_9 = arith.constant 0 : index
    %c0_10 = arith.constant 0 : index
    %36 = vector.load %arg1[%c0_8, %c0_9, %c0_10] : memref<9x128x128xbf16, #tpu.memory_space<vmem>>, vector<1x128x128xbf16>
    %37 = vector.shape_cast %36 : vector<1x128x128xbf16> to vector<128x128xbf16>
    %cst_11 = arith.constant dense<0.000000e+00> : vector<32x128xf32>
    %38 = tpu.matmul %35, %37, %cst_11 {dimension_numbers = #tpu.dot_dimension_numbers<[1], [0], [0], [1], [0, 0, 1, 1], [], []>} : vector<32x128xbf16>, vector<128x128xbf16>, vector<32x128xf32> -> vector<32x128xf32>
    %39 = arith.addf %27, %38 : vector<32x128xf32>
    %c1_i32_12 = arith.constant 1 : i32
    %40 = tpu.dynamic_rotate %26 by %c1_i32_12 dim 0 : vector<32x128xf32>, i32 -> vector<32x128xf32>
    %cst_13 = arith.constant 0.000000e+00 : f32
    %41 = vector.shape_cast %18 : vector<32x1xi1> to vector<32x1xi1>
    %42 = vector.broadcast %41 : vector<32x1xi1> to vector<32x128xi1>
    %43 = vector.broadcast %cst_13 : f32 to vector<32x128xf32>
    %44 = arith.select %42, %43, %40 : vector<32x128xi1>, vector<32x128xf32>
    %45 = arith.truncf %44 : vector<32x128xf32> to vector<32x128xbf16>
    %c1 = arith.constant 1 : index
    %c0_14 = arith.constant 0 : index
    %c0_15 = arith.constant 0 : index
    %46 = vector.load %arg1[%c1, %c0_14, %c0_15] : memref<9x128x128xbf16, #tpu.memory_space<vmem>>, vector<1x128x128xbf16>
    %47 = vector.shape_cast %46 : vector<1x128x128xbf16> to vector<128x128xbf16>
    %cst_16 = arith.constant dense<0.000000e+00> : vector<32x128xf32>
    %48 = tpu.matmul %45, %47, %cst_16 {dimension_numbers = #tpu.dot_dimension_numbers<[1], [0], [0], [1], [0, 0, 1, 1], [], []>} : vector<32x128xbf16>, vector<128x128xbf16>, vector<32x128xf32> -> vector<32x128xf32>
    %49 = arith.addf %39, %48 : vector<32x128xf32>
    %c1_i32_17 = arith.constant 1 : i32
    %50 = tpu.dynamic_rotate %26 by %c1_i32_17 dim 0 : vector<32x128xf32>, i32 -> vector<32x128xf32>
    %c120_i32_18 = arith.constant 120 : i32
    %51 = tpu.dynamic_rotate %50 by %c120_i32_18 dim 1 : vector<32x128xf32>, i32 -> vector<32x128xf32>
    %52 = vector.broadcast %18 : vector<32x1xi1> to vector<32x128xi1>
    %53 = vector.broadcast %25 : vector<1x128xi1> to vector<32x128xi1>
    %54 = arith.ori %52, %53 : vector<32x128xi1>
    %cst_19 = arith.constant 0.000000e+00 : f32
    %55 = vector.broadcast %cst_19 : f32 to vector<32x128xf32>
    %56 = arith.select %54, %55, %51 : vector<32x128xi1>, vector<32x128xf32>
    %57 = arith.truncf %56 : vector<32x128xf32> to vector<32x128xbf16>
    %c2 = arith.constant 2 : index
    %c0_20 = arith.constant 0 : index
    %c0_21 = arith.constant 0 : index
    %58 = vector.load %arg1[%c2, %c0_20, %c0_21] : memref<9x128x128xbf16, #tpu.memory_space<vmem>>, vector<1x128x128xbf16>
    %59 = vector.shape_cast %58 : vector<1x128x128xbf16> to vector<128x128xbf16>
    %cst_22 = arith.constant dense<0.000000e+00> : vector<32x128xf32>
    %60 = tpu.matmul %57, %59, %cst_22 {dimension_numbers = #tpu.dot_dimension_numbers<[1], [0], [0], [1], [0, 0, 1, 1], [], []>} : vector<32x128xbf16>, vector<128x128xbf16>, vector<32x128xf32> -> vector<32x128xf32>
    %61 = arith.addf %49, %60 : vector<32x128xf32>
    %c8_i32_23 = arith.constant 8 : i32
    %62 = tpu.dynamic_rotate %26 by %c8_i32_23 dim 1 : vector<32x128xf32>, i32 -> vector<32x128xf32>
    %cst_24 = arith.constant 0.000000e+00 : f32
    %63 = vector.shape_cast %23 : vector<1x128xi1> to vector<1x128xi1>
    %64 = vector.broadcast %63 : vector<1x128xi1> to vector<32x128xi1>
    %65 = vector.broadcast %cst_24 : f32 to vector<32x128xf32>
    %66 = arith.select %64, %65, %62 : vector<32x128xi1>, vector<32x128xf32>
    %67 = arith.truncf %66 : vector<32x128xf32> to vector<32x128xbf16>
    %c3 = arith.constant 3 : index
    %c0_25 = arith.constant 0 : index
    %c0_26 = arith.constant 0 : index
    %68 = vector.load %arg1[%c3, %c0_25, %c0_26] : memref<9x128x128xbf16, #tpu.memory_space<vmem>>, vector<1x128x128xbf16>
    %69 = vector.shape_cast %68 : vector<1x128x128xbf16> to vector<128x128xbf16>
    %cst_27 = arith.constant dense<0.000000e+00> : vector<32x128xf32>
    %70 = tpu.matmul %67, %69, %cst_27 {dimension_numbers = #tpu.dot_dimension_numbers<[1], [0], [0], [1], [0, 0, 1, 1], [], []>} : vector<32x128xbf16>, vector<128x128xbf16>, vector<32x128xf32> -> vector<32x128xf32>
    %71 = arith.addf %61, %70 : vector<32x128xf32>
    %72 = arith.truncf %26 : vector<32x128xf32> to vector<32x128xbf16>
    %c4 = arith.constant 4 : index
    %c0_28 = arith.constant 0 : index
    %c0_29 = arith.constant 0 : index
    %73 = vector.load %arg1[%c4, %c0_28, %c0_29] : memref<9x128x128xbf16, #tpu.memory_space<vmem>>, vector<1x128x128xbf16>
    %74 = vector.shape_cast %73 : vector<1x128x128xbf16> to vector<128x128xbf16>
    %cst_30 = arith.constant dense<0.000000e+00> : vector<32x128xf32>
    %75 = tpu.matmul %72, %74, %cst_30 {dimension_numbers = #tpu.dot_dimension_numbers<[1], [0], [0], [1], [0, 0, 1, 1], [], []>} : vector<32x128xbf16>, vector<128x128xbf16>, vector<32x128xf32> -> vector<32x128xf32>
    %76 = arith.addf %71, %75 : vector<32x128xf32>
    %c120_i32_31 = arith.constant 120 : i32
    %77 = tpu.dynamic_rotate %26 by %c120_i32_31 dim 1 : vector<32x128xf32>, i32 -> vector<32x128xf32>
    %cst_32 = arith.constant 0.000000e+00 : f32
    %78 = vector.shape_cast %25 : vector<1x128xi1> to vector<1x128xi1>
    %79 = vector.broadcast %78 : vector<1x128xi1> to vector<32x128xi1>
    %80 = vector.broadcast %cst_32 : f32 to vector<32x128xf32>
    %81 = arith.select %79, %80, %77 : vector<32x128xi1>, vector<32x128xf32>
    %82 = arith.truncf %81 : vector<32x128xf32> to vector<32x128xbf16>
    %c5 = arith.constant 5 : index
    %c0_33 = arith.constant 0 : index
    %c0_34 = arith.constant 0 : index
    %83 = vector.load %arg1[%c5, %c0_33, %c0_34] : memref<9x128x128xbf16, #tpu.memory_space<vmem>>, vector<1x128x128xbf16>
    %84 = vector.shape_cast %83 : vector<1x128x128xbf16> to vector<128x128xbf16>
    %cst_35 = arith.constant dense<0.000000e+00> : vector<32x128xf32>
    %85 = tpu.matmul %82, %84, %cst_35 {dimension_numbers = #tpu.dot_dimension_numbers<[1], [0], [0], [1], [0, 0, 1, 1], [], []>} : vector<32x128xbf16>, vector<128x128xbf16>, vector<32x128xf32> -> vector<32x128xf32>
    %86 = arith.addf %76, %85 : vector<32x128xf32>
    %c31_i32 = arith.constant 31 : i32
    %87 = tpu.dynamic_rotate %26 by %c31_i32 dim 0 : vector<32x128xf32>, i32 -> vector<32x128xf32>
    %c8_i32_36 = arith.constant 8 : i32
    %88 = tpu.dynamic_rotate %87 by %c8_i32_36 dim 1 : vector<32x128xf32>, i32 -> vector<32x128xf32>
    %89 = vector.broadcast %20 : vector<32x1xi1> to vector<32x128xi1>
    %90 = vector.broadcast %23 : vector<1x128xi1> to vector<32x128xi1>
    %91 = arith.ori %89, %90 : vector<32x128xi1>
    %cst_37 = arith.constant 0.000000e+00 : f32
    %92 = vector.broadcast %cst_37 : f32 to vector<32x128xf32>
    %93 = arith.select %91, %92, %88 : vector<32x128xi1>, vector<32x128xf32>
    %94 = arith.truncf %93 : vector<32x128xf32> to vector<32x128xbf16>
    %c6 = arith.constant 6 : index
    %c0_38 = arith.constant 0 : index
    %c0_39 = arith.constant 0 : index
    %95 = vector.load %arg1[%c6, %c0_38, %c0_39] : memref<9x128x128xbf16, #tpu.memory_space<vmem>>, vector<1x128x128xbf16>
    %96 = vector.shape_cast %95 : vector<1x128x128xbf16> to vector<128x128xbf16>
    %cst_40 = arith.constant dense<0.000000e+00> : vector<32x128xf32>
    %97 = tpu.matmul %94, %96, %cst_40 {dimension_numbers = #tpu.dot_dimension_numbers<[1], [0], [0], [1], [0, 0, 1, 1], [], []>} : vector<32x128xbf16>, vector<128x128xbf16>, vector<32x128xf32> -> vector<32x128xf32>
    %98 = arith.addf %86, %97 : vector<32x128xf32>
    %c31_i32_41 = arith.constant 31 : i32
    %99 = tpu.dynamic_rotate %26 by %c31_i32_41 dim 0 : vector<32x128xf32>, i32 -> vector<32x128xf32>
    %cst_42 = arith.constant 0.000000e+00 : f32
    %100 = vector.shape_cast %20 : vector<32x1xi1> to vector<32x1xi1>
    %101 = vector.broadcast %100 : vector<32x1xi1> to vector<32x128xi1>
    %102 = vector.broadcast %cst_42 : f32 to vector<32x128xf32>
    %103 = arith.select %101, %102, %99 : vector<32x128xi1>, vector<32x128xf32>
    %104 = arith.truncf %103 : vector<32x128xf32> to vector<32x128xbf16>
    %c7 = arith.constant 7 : index
    %c0_43 = arith.constant 0 : index
    %c0_44 = arith.constant 0 : index
    %105 = vector.load %arg1[%c7, %c0_43, %c0_44] : memref<9x128x128xbf16, #tpu.memory_space<vmem>>, vector<1x128x128xbf16>
    %106 = vector.shape_cast %105 : vector<1x128x128xbf16> to vector<128x128xbf16>
    %cst_45 = arith.constant dense<0.000000e+00> : vector<32x128xf32>
    %107 = tpu.matmul %104, %106, %cst_45 {dimension_numbers = #tpu.dot_dimension_numbers<[1], [0], [0], [1], [0, 0, 1, 1], [], []>} : vector<32x128xbf16>, vector<128x128xbf16>, vector<32x128xf32> -> vector<32x128xf32>
    %108 = arith.addf %98, %107 : vector<32x128xf32>
    %c31_i32_46 = arith.constant 31 : i32
    %109 = tpu.dynamic_rotate %26 by %c31_i32_46 dim 0 : vector<32x128xf32>, i32 -> vector<32x128xf32>
    %c120_i32_47 = arith.constant 120 : i32
    %110 = tpu.dynamic_rotate %109 by %c120_i32_47 dim 1 : vector<32x128xf32>, i32 -> vector<32x128xf32>
    %111 = vector.broadcast %20 : vector<32x1xi1> to vector<32x128xi1>
    %112 = vector.broadcast %25 : vector<1x128xi1> to vector<32x128xi1>
    %113 = arith.ori %111, %112 : vector<32x128xi1>
    %cst_48 = arith.constant 0.000000e+00 : f32
    %114 = vector.broadcast %cst_48 : f32 to vector<32x128xf32>
    %115 = arith.select %113, %114, %110 : vector<32x128xi1>, vector<32x128xf32>
    %116 = arith.truncf %115 : vector<32x128xf32> to vector<32x128xbf16>
    %c8 = arith.constant 8 : index
    %c0_49 = arith.constant 0 : index
    %c0_50 = arith.constant 0 : index
    %117 = vector.load %arg1[%c8, %c0_49, %c0_50] : memref<9x128x128xbf16, #tpu.memory_space<vmem>>, vector<1x128x128xbf16>
    %118 = vector.shape_cast %117 : vector<1x128x128xbf16> to vector<128x128xbf16>
    %cst_51 = arith.constant dense<0.000000e+00> : vector<32x128xf32>
    %119 = tpu.matmul %116, %118, %cst_51 {dimension_numbers = #tpu.dot_dimension_numbers<[1], [0], [0], [1], [0, 0, 1, 1], [], []>} : vector<32x128xbf16>, vector<128x128xbf16>, vector<32x128xf32> -> vector<32x128xf32>
    %120 = arith.addf %108, %119 : vector<32x128xf32>
    %c0_52 = arith.constant 0 : index
    %c0_53 = arith.constant 0 : index
    %121 = vector.load %arg3[%c0_52, %c0_53] : memref<1x128xf32, #tpu.memory_space<vmem>>, vector<1x128xf32>
    %c0_54 = arith.constant 0 : index
    %c0_55 = arith.constant 0 : index
    %122 = vector.load %arg4[%c0_54, %c0_55] : memref<1x128xf32, #tpu.memory_space<vmem>>, vector<1x128xf32>
    %cst_56 = arith.constant dense<0.000000e+00> : vector<128xf32>
    %123 = vector.multi_reduction <add>, %120, %cst_56 [0] : vector<32x128xf32> to vector<128xf32>
    %124 = vector.shape_cast %123 : vector<128xf32> to vector<1x128xf32>
    %125 = arith.mulf %120, %120 : vector<32x128xf32>
    %cst_57 = arith.constant dense<0.000000e+00> : vector<128xf32>
    %126 = vector.multi_reduction <add>, %125, %cst_57 [0] : vector<32x128xf32> to vector<128xf32>
    %127 = vector.shape_cast %126 : vector<128xf32> to vector<1x128xf32>
    %c8_i32_58 = arith.constant 8 : i32
    %128 = tpu.dynamic_rotate %124 by %c8_i32_58 dim 1 : vector<1x128xf32>, i32 -> vector<1x128xf32>
    %129 = arith.addf %124, %128 : vector<1x128xf32>
    %c16_i32_59 = arith.constant 16 : i32
    %130 = tpu.dynamic_rotate %129 by %c16_i32_59 dim 1 : vector<1x128xf32>, i32 -> vector<1x128xf32>
    %131 = arith.addf %129, %130 : vector<1x128xf32>
    %c32_i32 = arith.constant 32 : i32
    %132 = tpu.dynamic_rotate %131 by %c32_i32 dim 1 : vector<1x128xf32>, i32 -> vector<1x128xf32>
    %133 = arith.addf %131, %132 : vector<1x128xf32>
    %c64_i32 = arith.constant 64 : i32
    %134 = tpu.dynamic_rotate %133 by %c64_i32 dim 1 : vector<1x128xf32>, i32 -> vector<1x128xf32>
    %135 = arith.addf %133, %134 : vector<1x128xf32>
    %cst_60 = arith.constant 0.001953125 : f32
    %136 = vector.broadcast %cst_60 : f32 to vector<1x128xf32>
    %137 = arith.mulf %135, %136 : vector<1x128xf32>
    %c8_i32_61 = arith.constant 8 : i32
    %138 = tpu.dynamic_rotate %127 by %c8_i32_61 dim 1 : vector<1x128xf32>, i32 -> vector<1x128xf32>
    %139 = arith.addf %127, %138 : vector<1x128xf32>
    %c16_i32_62 = arith.constant 16 : i32
    %140 = tpu.dynamic_rotate %139 by %c16_i32_62 dim 1 : vector<1x128xf32>, i32 -> vector<1x128xf32>
    %141 = arith.addf %139, %140 : vector<1x128xf32>
    %c32_i32_63 = arith.constant 32 : i32
    %142 = tpu.dynamic_rotate %141 by %c32_i32_63 dim 1 : vector<1x128xf32>, i32 -> vector<1x128xf32>
    %143 = arith.addf %141, %142 : vector<1x128xf32>
    %c64_i32_64 = arith.constant 64 : i32
    %144 = tpu.dynamic_rotate %143 by %c64_i32_64 dim 1 : vector<1x128xf32>, i32 -> vector<1x128xf32>
    %145 = arith.addf %143, %144 : vector<1x128xf32>
    %cst_65 = arith.constant 0.001953125 : f32
    %146 = vector.broadcast %cst_65 : f32 to vector<1x128xf32>
    %147 = arith.mulf %145, %146 : vector<1x128xf32>
    %148 = arith.mulf %137, %137 : vector<1x128xf32>
    %149 = arith.subf %147, %148 : vector<1x128xf32>
    %cst_66 = arith.constant 0.000000e+00 : f32
    %150 = vector.broadcast %cst_66 : f32 to vector<1x128xf32>
    %151 = arith.maximumf %149, %150 : vector<1x128xf32>
    %cst_67 = arith.constant 9.99999974E-6 : f32
    %152 = vector.broadcast %cst_67 : f32 to vector<1x128xf32>
    %153 = arith.addf %151, %152 : vector<1x128xf32>
    %154 = math.rsqrt %153 : vector<1x128xf32>
    %155 = arith.mulf %121, %154 : vector<1x128xf32>
    %156 = arith.mulf %137, %155 : vector<1x128xf32>
    %157 = arith.subf %122, %156 : vector<1x128xf32>
    %158 = vector.broadcast %155 : vector<1x128xf32> to vector<32x128xf32>
    %159 = arith.mulf %120, %158 : vector<32x128xf32>
    %160 = vector.broadcast %157 : vector<1x128xf32> to vector<32x128xf32>
    %161 = arith.addf %159, %160 : vector<32x128xf32>
    %cst_68 = arith.constant 0.000000e+00 : f32
    %162 = vector.broadcast %cst_68 : f32 to vector<32x128xf32>
    %163 = arith.maximumf %161, %162 : vector<32x128xf32>
    %cst_69 = arith.constant 0.000000e+00 : f32
    %164 = vector.broadcast %cst_69 : f32 to vector<32x128xf32>
    %c1_i32_70 = arith.constant 1 : i32
    %165 = tpu.dynamic_rotate %163 by %c1_i32_70 dim 0 : vector<32x128xf32>, i32 -> vector<32x128xf32>
    %c8_i32_71 = arith.constant 8 : i32
    %166 = tpu.dynamic_rotate %165 by %c8_i32_71 dim 1 : vector<32x128xf32>, i32 -> vector<32x128xf32>
    %167 = vector.broadcast %18 : vector<32x1xi1> to vector<32x128xi1>
    %168 = vector.broadcast %23 : vector<1x128xi1> to vector<32x128xi1>
    %169 = arith.ori %167, %168 : vector<32x128xi1>
    %cst_72 = arith.constant 0.000000e+00 : f32
    %170 = vector.broadcast %cst_72 : f32 to vector<32x128xf32>
    %171 = arith.select %169, %170, %166 : vector<32x128xi1>, vector<32x128xf32>
    %172 = arith.truncf %171 : vector<32x128xf32> to vector<32x128xbf16>
    %c0_73 = arith.constant 0 : index
    %c0_74 = arith.constant 0 : index
    %c0_75 = arith.constant 0 : index
    %173 = vector.load %arg2[%c0_73, %c0_74, %c0_75] : memref<9x128x128xbf16, #tpu.memory_space<vmem>>, vector<1x128x128xbf16>
    %174 = vector.shape_cast %173 : vector<1x128x128xbf16> to vector<128x128xbf16>
    %cst_76 = arith.constant dense<0.000000e+00> : vector<32x128xf32>
    %175 = tpu.matmul %172, %174, %cst_76 {dimension_numbers = #tpu.dot_dimension_numbers<[1], [0], [0], [1], [0, 0, 1, 1], [], []>} : vector<32x128xbf16>, vector<128x128xbf16>, vector<32x128xf32> -> vector<32x128xf32>
    %176 = arith.addf %164, %175 : vector<32x128xf32>
    %c1_i32_77 = arith.constant 1 : i32
    %177 = tpu.dynamic_rotate %163 by %c1_i32_77 dim 0 : vector<32x128xf32>, i32 -> vector<32x128xf32>
    %cst_78 = arith.constant 0.000000e+00 : f32
    %178 = vector.shape_cast %18 : vector<32x1xi1> to vector<32x1xi1>
    %179 = vector.broadcast %178 : vector<32x1xi1> to vector<32x128xi1>
    %180 = vector.broadcast %cst_78 : f32 to vector<32x128xf32>
    %181 = arith.select %179, %180, %177 : vector<32x128xi1>, vector<32x128xf32>
    %182 = arith.truncf %181 : vector<32x128xf32> to vector<32x128xbf16>
    %c1_79 = arith.constant 1 : index
    %c0_80 = arith.constant 0 : index
    %c0_81 = arith.constant 0 : index
    %183 = vector.load %arg2[%c1_79, %c0_80, %c0_81] : memref<9x128x128xbf16, #tpu.memory_space<vmem>>, vector<1x128x128xbf16>
    %184 = vector.shape_cast %183 : vector<1x128x128xbf16> to vector<128x128xbf16>
    %cst_82 = arith.constant dense<0.000000e+00> : vector<32x128xf32>
    %185 = tpu.matmul %182, %184, %cst_82 {dimension_numbers = #tpu.dot_dimension_numbers<[1], [0], [0], [1], [0, 0, 1, 1], [], []>} : vector<32x128xbf16>, vector<128x128xbf16>, vector<32x128xf32> -> vector<32x128xf32>
    %186 = arith.addf %176, %185 : vector<32x128xf32>
    %c1_i32_83 = arith.constant 1 : i32
    %187 = tpu.dynamic_rotate %163 by %c1_i32_83 dim 0 : vector<32x128xf32>, i32 -> vector<32x128xf32>
    %c120_i32_84 = arith.constant 120 : i32
    %188 = tpu.dynamic_rotate %187 by %c120_i32_84 dim 1 : vector<32x128xf32>, i32 -> vector<32x128xf32>
    %189 = vector.broadcast %18 : vector<32x1xi1> to vector<32x128xi1>
    %190 = vector.broadcast %25 : vector<1x128xi1> to vector<32x128xi1>
    %191 = arith.ori %189, %190 : vector<32x128xi1>
    %cst_85 = arith.constant 0.000000e+00 : f32
    %192 = vector.broadcast %cst_85 : f32 to vector<32x128xf32>
    %193 = arith.select %191, %192, %188 : vector<32x128xi1>, vector<32x128xf32>
    %194 = arith.truncf %193 : vector<32x128xf32> to vector<32x128xbf16>
    %c2_86 = arith.constant 2 : index
    %c0_87 = arith.constant 0 : index
    %c0_88 = arith.constant 0 : index
    %195 = vector.load %arg2[%c2_86, %c0_87, %c0_88] : memref<9x128x128xbf16, #tpu.memory_space<vmem>>, vector<1x128x128xbf16>
    %196 = vector.shape_cast %195 : vector<1x128x128xbf16> to vector<128x128xbf16>
    %cst_89 = arith.constant dense<0.000000e+00> : vector<32x128xf32>
    %197 = tpu.matmul %194, %196, %cst_89 {dimension_numbers = #tpu.dot_dimension_numbers<[1], [0], [0], [1], [0, 0, 1, 1], [], []>} : vector<32x128xbf16>, vector<128x128xbf16>, vector<32x128xf32> -> vector<32x128xf32>
    %198 = arith.addf %186, %197 : vector<32x128xf32>
    %c8_i32_90 = arith.constant 8 : i32
    %199 = tpu.dynamic_rotate %163 by %c8_i32_90 dim 1 : vector<32x128xf32>, i32 -> vector<32x128xf32>
    %cst_91 = arith.constant 0.000000e+00 : f32
    %200 = vector.shape_cast %23 : vector<1x128xi1> to vector<1x128xi1>
    %201 = vector.broadcast %200 : vector<1x128xi1> to vector<32x128xi1>
    %202 = vector.broadcast %cst_91 : f32 to vector<32x128xf32>
    %203 = arith.select %201, %202, %199 : vector<32x128xi1>, vector<32x128xf32>
    %204 = arith.truncf %203 : vector<32x128xf32> to vector<32x128xbf16>
    %c3_92 = arith.constant 3 : index
    %c0_93 = arith.constant 0 : index
    %c0_94 = arith.constant 0 : index
    %205 = vector.load %arg2[%c3_92, %c0_93, %c0_94] : memref<9x128x128xbf16, #tpu.memory_space<vmem>>, vector<1x128x128xbf16>
    %206 = vector.shape_cast %205 : vector<1x128x128xbf16> to vector<128x128xbf16>
    %cst_95 = arith.constant dense<0.000000e+00> : vector<32x128xf32>
    %207 = tpu.matmul %204, %206, %cst_95 {dimension_numbers = #tpu.dot_dimension_numbers<[1], [0], [0], [1], [0, 0, 1, 1], [], []>} : vector<32x128xbf16>, vector<128x128xbf16>, vector<32x128xf32> -> vector<32x128xf32>
    %208 = arith.addf %198, %207 : vector<32x128xf32>
    %209 = arith.truncf %163 : vector<32x128xf32> to vector<32x128xbf16>
    %c4_96 = arith.constant 4 : index
    %c0_97 = arith.constant 0 : index
    %c0_98 = arith.constant 0 : index
    %210 = vector.load %arg2[%c4_96, %c0_97, %c0_98] : memref<9x128x128xbf16, #tpu.memory_space<vmem>>, vector<1x128x128xbf16>
    %211 = vector.shape_cast %210 : vector<1x128x128xbf16> to vector<128x128xbf16>
    %cst_99 = arith.constant dense<0.000000e+00> : vector<32x128xf32>
    %212 = tpu.matmul %209, %211, %cst_99 {dimension_numbers = #tpu.dot_dimension_numbers<[1], [0], [0], [1], [0, 0, 1, 1], [], []>} : vector<32x128xbf16>, vector<128x128xbf16>, vector<32x128xf32> -> vector<32x128xf32>
    %213 = arith.addf %208, %212 : vector<32x128xf32>
    %c120_i32_100 = arith.constant 120 : i32
    %214 = tpu.dynamic_rotate %163 by %c120_i32_100 dim 1 : vector<32x128xf32>, i32 -> vector<32x128xf32>
    %cst_101 = arith.constant 0.000000e+00 : f32
    %215 = vector.shape_cast %25 : vector<1x128xi1> to vector<1x128xi1>
    %216 = vector.broadcast %215 : vector<1x128xi1> to vector<32x128xi1>
    %217 = vector.broadcast %cst_101 : f32 to vector<32x128xf32>
    %218 = arith.select %216, %217, %214 : vector<32x128xi1>, vector<32x128xf32>
    %219 = arith.truncf %218 : vector<32x128xf32> to vector<32x128xbf16>
    %c5_102 = arith.constant 5 : index
    %c0_103 = arith.constant 0 : index
    %c0_104 = arith.constant 0 : index
    %220 = vector.load %arg2[%c5_102, %c0_103, %c0_104] : memref<9x128x128xbf16, #tpu.memory_space<vmem>>, vector<1x128x128xbf16>
    %221 = vector.shape_cast %220 : vector<1x128x128xbf16> to vector<128x128xbf16>
    %cst_105 = arith.constant dense<0.000000e+00> : vector<32x128xf32>
    %222 = tpu.matmul %219, %221, %cst_105 {dimension_numbers = #tpu.dot_dimension_numbers<[1], [0], [0], [1], [0, 0, 1, 1], [], []>} : vector<32x128xbf16>, vector<128x128xbf16>, vector<32x128xf32> -> vector<32x128xf32>
    %223 = arith.addf %213, %222 : vector<32x128xf32>
    %c31_i32_106 = arith.constant 31 : i32
    %224 = tpu.dynamic_rotate %163 by %c31_i32_106 dim 0 : vector<32x128xf32>, i32 -> vector<32x128xf32>
    %c8_i32_107 = arith.constant 8 : i32
    %225 = tpu.dynamic_rotate %224 by %c8_i32_107 dim 1 : vector<32x128xf32>, i32 -> vector<32x128xf32>
    %226 = vector.broadcast %20 : vector<32x1xi1> to vector<32x128xi1>
    %227 = vector.broadcast %23 : vector<1x128xi1> to vector<32x128xi1>
    %228 = arith.ori %226, %227 : vector<32x128xi1>
    %cst_108 = arith.constant 0.000000e+00 : f32
    %229 = vector.broadcast %cst_108 : f32 to vector<32x128xf32>
    %230 = arith.select %228, %229, %225 : vector<32x128xi1>, vector<32x128xf32>
    %231 = arith.truncf %230 : vector<32x128xf32> to vector<32x128xbf16>
    %c6_109 = arith.constant 6 : index
    %c0_110 = arith.constant 0 : index
    %c0_111 = arith.constant 0 : index
    %232 = vector.load %arg2[%c6_109, %c0_110, %c0_111] : memref<9x128x128xbf16, #tpu.memory_space<vmem>>, vector<1x128x128xbf16>
    %233 = vector.shape_cast %232 : vector<1x128x128xbf16> to vector<128x128xbf16>
    %cst_112 = arith.constant dense<0.000000e+00> : vector<32x128xf32>
    %234 = tpu.matmul %231, %233, %cst_112 {dimension_numbers = #tpu.dot_dimension_numbers<[1], [0], [0], [1], [0, 0, 1, 1], [], []>} : vector<32x128xbf16>, vector<128x128xbf16>, vector<32x128xf32> -> vector<32x128xf32>
    %235 = arith.addf %223, %234 : vector<32x128xf32>
    %c31_i32_113 = arith.constant 31 : i32
    %236 = tpu.dynamic_rotate %163 by %c31_i32_113 dim 0 : vector<32x128xf32>, i32 -> vector<32x128xf32>
    %cst_114 = arith.constant 0.000000e+00 : f32
    %237 = vector.shape_cast %20 : vector<32x1xi1> to vector<32x1xi1>
    %238 = vector.broadcast %237 : vector<32x1xi1> to vector<32x128xi1>
    %239 = vector.broadcast %cst_114 : f32 to vector<32x128xf32>
    %240 = arith.select %238, %239, %236 : vector<32x128xi1>, vector<32x128xf32>
    %241 = arith.truncf %240 : vector<32x128xf32> to vector<32x128xbf16>
    %c7_115 = arith.constant 7 : index
    %c0_116 = arith.constant 0 : index
    %c0_117 = arith.constant 0 : index
    %242 = vector.load %arg2[%c7_115, %c0_116, %c0_117] : memref<9x128x128xbf16, #tpu.memory_space<vmem>>, vector<1x128x128xbf16>
    %243 = vector.shape_cast %242 : vector<1x128x128xbf16> to vector<128x128xbf16>
    %cst_118 = arith.constant dense<0.000000e+00> : vector<32x128xf32>
    %244 = tpu.matmul %241, %243, %cst_118 {dimension_numbers = #tpu.dot_dimension_numbers<[1], [0], [0], [1], [0, 0, 1, 1], [], []>} : vector<32x128xbf16>, vector<128x128xbf16>, vector<32x128xf32> -> vector<32x128xf32>
    %245 = arith.addf %235, %244 : vector<32x128xf32>
    %c31_i32_119 = arith.constant 31 : i32
    %246 = tpu.dynamic_rotate %163 by %c31_i32_119 dim 0 : vector<32x128xf32>, i32 -> vector<32x128xf32>
    %c120_i32_120 = arith.constant 120 : i32
    %247 = tpu.dynamic_rotate %246 by %c120_i32_120 dim 1 : vector<32x128xf32>, i32 -> vector<32x128xf32>
    %248 = vector.broadcast %20 : vector<32x1xi1> to vector<32x128xi1>
    %249 = vector.broadcast %25 : vector<1x128xi1> to vector<32x128xi1>
    %250 = arith.ori %248, %249 : vector<32x128xi1>
    %cst_121 = arith.constant 0.000000e+00 : f32
    %251 = vector.broadcast %cst_121 : f32 to vector<32x128xf32>
    %252 = arith.select %250, %251, %247 : vector<32x128xi1>, vector<32x128xf32>
    %253 = arith.truncf %252 : vector<32x128xf32> to vector<32x128xbf16>
    %c8_122 = arith.constant 8 : index
    %c0_123 = arith.constant 0 : index
    %c0_124 = arith.constant 0 : index
    %254 = vector.load %arg2[%c8_122, %c0_123, %c0_124] : memref<9x128x128xbf16, #tpu.memory_space<vmem>>, vector<1x128x128xbf16>
    %255 = vector.shape_cast %254 : vector<1x128x128xbf16> to vector<128x128xbf16>
    %cst_125 = arith.constant dense<0.000000e+00> : vector<32x128xf32>
    %256 = tpu.matmul %253, %255, %cst_125 {dimension_numbers = #tpu.dot_dimension_numbers<[1], [0], [0], [1], [0, 0, 1, 1], [], []>} : vector<32x128xbf16>, vector<128x128xbf16>, vector<32x128xf32> -> vector<32x128xf32>
    %257 = arith.addf %245, %256 : vector<32x128xf32>
    %c0_126 = arith.constant 0 : index
    %c0_127 = arith.constant 0 : index
    %258 = vector.load %arg5[%c0_126, %c0_127] : memref<1x128xf32, #tpu.memory_space<vmem>>, vector<1x128xf32>
    %c0_128 = arith.constant 0 : index
    %c0_129 = arith.constant 0 : index
    %259 = vector.load %arg6[%c0_128, %c0_129] : memref<1x128xf32, #tpu.memory_space<vmem>>, vector<1x128xf32>
    %cst_130 = arith.constant dense<0.000000e+00> : vector<128xf32>
    %260 = vector.multi_reduction <add>, %257, %cst_130 [0] : vector<32x128xf32> to vector<128xf32>
    %261 = vector.shape_cast %260 : vector<128xf32> to vector<1x128xf32>
    %262 = arith.mulf %257, %257 : vector<32x128xf32>
    %cst_131 = arith.constant dense<0.000000e+00> : vector<128xf32>
    %263 = vector.multi_reduction <add>, %262, %cst_131 [0] : vector<32x128xf32> to vector<128xf32>
    %264 = vector.shape_cast %263 : vector<128xf32> to vector<1x128xf32>
    %c8_i32_132 = arith.constant 8 : i32
    %265 = tpu.dynamic_rotate %261 by %c8_i32_132 dim 1 : vector<1x128xf32>, i32 -> vector<1x128xf32>
    %266 = arith.addf %261, %265 : vector<1x128xf32>
    %c16_i32_133 = arith.constant 16 : i32
    %267 = tpu.dynamic_rotate %266 by %c16_i32_133 dim 1 : vector<1x128xf32>, i32 -> vector<1x128xf32>
    %268 = arith.addf %266, %267 : vector<1x128xf32>
    %c32_i32_134 = arith.constant 32 : i32
    %269 = tpu.dynamic_rotate %268 by %c32_i32_134 dim 1 : vector<1x128xf32>, i32 -> vector<1x128xf32>
    %270 = arith.addf %268, %269 : vector<1x128xf32>
    %c64_i32_135 = arith.constant 64 : i32
    %271 = tpu.dynamic_rotate %270 by %c64_i32_135 dim 1 : vector<1x128xf32>, i32 -> vector<1x128xf32>
    %272 = arith.addf %270, %271 : vector<1x128xf32>
    %cst_136 = arith.constant 0.001953125 : f32
    %273 = vector.broadcast %cst_136 : f32 to vector<1x128xf32>
    %274 = arith.mulf %272, %273 : vector<1x128xf32>
    %c8_i32_137 = arith.constant 8 : i32
    %275 = tpu.dynamic_rotate %264 by %c8_i32_137 dim 1 : vector<1x128xf32>, i32 -> vector<1x128xf32>
    %276 = arith.addf %264, %275 : vector<1x128xf32>
    %c16_i32_138 = arith.constant 16 : i32
    %277 = tpu.dynamic_rotate %276 by %c16_i32_138 dim 1 : vector<1x128xf32>, i32 -> vector<1x128xf32>
    %278 = arith.addf %276, %277 : vector<1x128xf32>
    %c32_i32_139 = arith.constant 32 : i32
    %279 = tpu.dynamic_rotate %278 by %c32_i32_139 dim 1 : vector<1x128xf32>, i32 -> vector<1x128xf32>
    %280 = arith.addf %278, %279 : vector<1x128xf32>
    %c64_i32_140 = arith.constant 64 : i32
    %281 = tpu.dynamic_rotate %280 by %c64_i32_140 dim 1 : vector<1x128xf32>, i32 -> vector<1x128xf32>
    %282 = arith.addf %280, %281 : vector<1x128xf32>
    %cst_141 = arith.constant 0.001953125 : f32
    %283 = vector.broadcast %cst_141 : f32 to vector<1x128xf32>
    %284 = arith.mulf %282, %283 : vector<1x128xf32>
    %285 = arith.mulf %274, %274 : vector<1x128xf32>
    %286 = arith.subf %284, %285 : vector<1x128xf32>
    %cst_142 = arith.constant 0.000000e+00 : f32
    %287 = vector.broadcast %cst_142 : f32 to vector<1x128xf32>
    %288 = arith.maximumf %286, %287 : vector<1x128xf32>
    %cst_143 = arith.constant 9.99999974E-6 : f32
    %289 = vector.broadcast %cst_143 : f32 to vector<1x128xf32>
    %290 = arith.addf %288, %289 : vector<1x128xf32>
    %291 = math.rsqrt %290 : vector<1x128xf32>
    %292 = arith.mulf %258, %291 : vector<1x128xf32>
    %293 = arith.mulf %274, %292 : vector<1x128xf32>
    %294 = arith.subf %259, %293 : vector<1x128xf32>
    %295 = vector.broadcast %292 : vector<1x128xf32> to vector<32x128xf32>
    %296 = arith.mulf %257, %295 : vector<32x128xf32>
    %297 = vector.broadcast %294 : vector<1x128xf32> to vector<32x128xf32>
    %298 = arith.addf %296, %297 : vector<32x128xf32>
    %299 = arith.addf %298, %26 : vector<32x128xf32>
    %cst_144 = arith.constant 0.000000e+00 : f32
    %300 = vector.broadcast %cst_144 : f32 to vector<32x128xf32>
    %301 = arith.maximumf %299, %300 : vector<32x128xf32>
    %c0_145 = arith.constant 0 : index
    %c0_146 = arith.constant 0 : index
    %302 = vector.load %arg7[%c0_145, %c0_146] : memref<32x128xf32, #tpu.memory_space<vmem>>, vector<32x128xf32>
    tpu.vector_store %arg7[%c0_145, %c0_146], %301 {strides = array<i32>} : memref<32x128xf32, #tpu.memory_space<vmem>>, vector<32x128xf32>,
    return
  }
}

</mosaic_0001>

<bundles_post_ra>
// kernel: residual_forward.1
= control target key start
LH: loop header
LB: loop body
LE: loop exit
PB: predicated region body
PF: predicated region fallthrough
CT: control target
= control target key end

     0   :  { %12 = vsyncpa [#allocation3], 0  ;;  %s3927_s24 = smov [#allocation2]   ;;  %s4729_s0 = inlined_call_operand.vmem [shape: f32[32,128], index: 0, kind: input, shape index: {}]   ;;  %s4730_s1 = inlined_call_operand.vmem [shape: bf16[9,128,128], index: 1, kind: input, shape index: {}]   ;;  %s4731_s2 = inlined_call_operand.hbm [shape: bf16[9,128,128], index: 2, kind: input, shape index: {}]   ;;  %s4732_s3 = inlined_call_operand.vmem [shape: f32[1,128], index: 3, kind: input, shape index: {}]   ;;  %s4733_s4 = inlined_call_operand.vmem [shape: f32[1,128], index: 4, kind: input, shape index: {}]   ;;  %s4734_s5 = inlined_call_operand.vmem [shape: f32[1,128], index: 5, kind: input, shape index: {}]   ;;  %s4735_s6 = inlined_call_operand.vmem [shape: f32[1,128], index: 6, kind: input, shape index: {}]   ;;  %s4736_s7 = inlined_call_operand.vmem [shape: f32[32,128], index: 7, kind: output, shape index: {}]  }
   0x1   :  { %s22_s25 = sshll.u32 %s3927_s24, 4  ;;  %s23_s25 = int_to_ptr.vmem [resolvable:$true] %s22_s25 }
   0x2   :  { %s3913_s26 = scalar_lea.vmem %s23_s25, 9216  ;;  %p3918_p1 = scmp.lt.s32.totalorder %s23_s25, %s23_s25 }
   0x3   :  { %p3914_p0 = scmp.ne.s32.totalorder %s23_s25, %s3913_s26  ;;  %p3919_p2 = scmp.lt.s32.totalorder %s3913_s26, %s3913_s26 }
   0x5   :  { %p3920_p3 = por %p3919_p2, %p3918_p1 }
   0x7   :  { %p3921_p4 = pnand %p3920_p3, %p3914_p0 }
   0x9   :  { %3924 = shalt.err (!%p3921_p4)
}
   0xa   :  { %s3928_s27 = smov 64   ;;  %s3929_s28 = smov 4  }
   0xb   :  { %28 = dma.hbm_to_vmem [thread:$0]  %s4731_s2, 9216, %s23_s25, [#allocation3], %s3928_s27, %s3928_s27, %s3929_s28  }
   0xc   :  { %3925 = dma.done.wait [#allocation3], 9216  }
   0xd   :  { %3926 = vsyncadd [#allocation3], 4294958080  ;;  %v41_v0 = vlaneseq  ;;  %v3991_v4 = vld [vmem:[%s4729_s0] sm:$0xff]  ;;  %v3996_v5 = vld [vmem:[%s4729_s0 + $0x8] sm:$0xff]  ;;  %s3930_s19 = smov 120   ;;  %s3931_s20 = smov 8  }
   0xe   :  { %v109_v6 = vld [vmem:[%s4729_s0 + $0x18] sm:$0xff]  ;;  %v110_v7 = vrot.slane %v3991_v4, 7  ;;  %v111_v8 = vrot.slane %v3996_v5, 7  ;;  %v108_v10 = vld [vmem:[%s4729_s0 + $0x10] sm:$0xff]  ;;  %v902_v16 = vrot.slane %v3991_v4, 1  ;;  %vm4739_vm4 = vmmov 1  }
   0xf   :  { %v3981_v1 = vshrl.u32 %v41_v0, 7  ;;  %v113_v9 = vrot.slane %v109_v6, 7  ;;  %v112_v11 = vrot.slane %v108_v10, 7  ;;  %v3751_v12 = vld [vmem:[%s4730_s1 + $0x78] sm:$0xff]   ;;  %v3752_v15 = vld [vmem:[%s4730_s1 + $0x70] sm:$0xff]   ;;  %v904_v20 = vrot.slane %v108_v10, 1 }
  0x10   :  { %3263 = vmatprep.subr.bf16.mxu0 %v3751_v12  ;;  %v905_v22 = vrot.slane %v109_v6, 1  ;;  %v3753_v25 = vld [vmem:[%s4730_s1 + $0x68] sm:$0xff]   ;;  %v3651_v29 = vpack.i.bf16 %v3996_v5, %v3991_v4  ;;  %v3656_v30 = vpack.i.bf16 %v109_v6, %v108_v10  ;;  %v903_v31 = vrot.slane %v3996_v5, 1  ;;  %v3754_v32 = vld [vmem:[%s4730_s1 + $0x60] sm:$0xff]   ;;  %v3759_v33 = vld [vmem:[%s4730_s1 + $0x38] sm:$0xff]   ;;  %s3934_s16 = smov 32  }
  0x11   :  { %v50_v2 = vand.u32 15, %v3981_v1  ;;  %vm4738_vm1 = vcmp.lt.s32.totalorder %v3981_v1, 1  ;;  %3264 = vmatpush3.bf16.msra.mxu0 %v3751_v12  ;;  %vm4737_vm3 = vcmp.lt.s32.totalorder %v3981_v1, 7  ;;  %3283 = vmatprep.subr.bf16.mxu1 %v3759_v33  ;;  %v3761_v34 = vld [vmem:[%s4730_s1 + $0x30] sm:$0xff]   ;;  %v3755_v37 = vld [vmem:[%s4730_s1 + $0x58] sm:$0xff]   ;;  %v3763_v38 = vld [vmem:[%s4730_s1 + $0x28] sm:$0xff]  }
  0x12   :  { %v117_v13 = vsel %vm4738_vm1, %v110_v7, %v111_v8  ;;  %v118_v14 = vsel %vm4738_vm1, %v113_v9, %v110_v7  ;;  %v4022_v18 = vsel %vm4738_vm1, %v112_v11, %v113_v9  ;;  %v4026_v19 = vsel %vm4738_vm1, %v111_v8, %v112_v11  ;;  %3265 = vmatprep.subr.bf16.mxu0 %v3752_v15  ;;  %v3756_v41 = vld [vmem:[%s4730_s1 + $0x50] sm:$0xff]   ;;  %v3765_v43 = vld [vmem:[%s4730_s1 + $0x20] sm:$0xff]   ;;  %v3757_v44 = vld [vmem:[%s4730_s1 + $0x48] sm:$0xff]  }
  0x13   :  { %vm3984_vm0 = vcmp.eq.s32.totalorder %v50_v2, 0  ;;  %v3641_v17 = vpack.i.bf16 %v117_v13, %v118_v14  ;;  %v3646_v21 = vpack.i.bf16 %v4022_v18, %v4026_v19  ;;  %v2685_v24 = vpack.c.bf16 %v117_v13, %v118_v14  ;;  %3284 = vmatpush3.bf16.msra.mxu1 %v3759_v33  ;;  %v3767_v46 = vld [vmem:[%s4730_s1 + $0x18] sm:$0xff]   ;;  %v3758_v47 = vld [vmem:[%s4730_s1 + $0x40] sm:$0xff]   ;;  %v3769_v49 = vld [vmem:[%s4730_s1 + $0x10] sm:$0xff]  }
  0x14   :  { %vm2683_vm2 = vmneg %vm3984_vm0  ;;  %v4046_v26 = vsel %vm4737_vm3, %v904_v20, %v905_v22  ;;  %v4050_v27 = vsel %vm4737_vm3, %v905_v22, %v902_v16  ;;  %v4074_v35 = vsel %vm4737_vm3, %v903_v31, %v904_v20  ;;  %v4078_v36 = vsel %vm4737_vm3, %v902_v16, %v903_v31  ;;  %3285 = vmatprep.subr.bf16.mxu1 %v3761_v34  ;;  %v3760_v50 = vld [vmem:[%s4730_s1 + $0xb8] sm:$0xff]   ;;  %v3771_v52 = vld [vmem:[%s4730_s1 + $0x8] sm:$0xff]  }
  0x15   :  { %3642 = vrot.lane.b32.xlu1 %v3641_v17, %s3930_s19  ;;  %3632 = vrot.lane.b32.xlu0 %v3641_v17, %s3931_s20  ;;  %vm4037_vm5 = vmpackc.low %vm4739_vm4, %vm2683_vm2  ;;  %v2899_v28 = vpack.c.bf16 %v4050_v27, %v4046_v26  ;;  %v3671_v39 = vpack.i.bf16 %v4074_v35, %v4078_v36  ;;  %v3676_v40 = vpack.i.bf16 %v4050_v27, %v4046_v26  ;;  %v44_v42 = vadd.s32 16, %v3981_v1  ;;  %v3762_v54 = vld [vmem:[%s4730_s1 + $0xb0] sm:$0xff]   ;;  %v3773_v55 = vld [vmem:[%s4730_s1] sm:$0xff]  }
  0x16   :  { %3279 = vmatprep.mubr.msk.bf16.mxu0 %vm4037_vm5, %v2685_v24  ;;  %3266 = vmatpush3.bf16.msra.mxu0 %v3752_v15  ;;  %v2689_v51 = vpack.c.bf16 %v4022_v18, %v4026_v19  ;;  %v3764_v56 = vld [vmem:[%s4730_s1 + $0xa8] sm:$0xff]   ;;  %v4148_v57 = vld [vmem:[%s4730_s1 + $0xf8] sm:$0xff]   ;;  %v3766_v58 = vld [vmem:[%s4730_s1 + $0xa0] sm:$0xff]   ;;  %v4170_v2 = vand.u32 127, %v41_v0  ;;  %v4767_v16 = vmov 0 }
  0x17   :  { %3267 = vmatprep.subr.bf16.mxu0 %v3753_v25  ;;  %3286 = vmatpush3.bf16.msra.mxu1 %v3761_v34  ;;  %v64_v45 = vand.u32 15, %v44_v42  ;;  %v3768_v59 = vld [vmem:[%s4730_s1 + $0x98] sm:$0xff]   ;;  %v3770_v60 = vld [vmem:[%s4730_s1 + $0x90] sm:$0xff]   ;;  %v3772_v61 = vld [vmem:[%s4730_s1 + $0x88] sm:$0xff]   ;;  %v650_v34 = vpack.c.bf16 %v3996_v5, %v3991_v4 }
  0x18   :  { %3287 = vmatprep.subr.bf16.mxu1 %v3763_v38  ;;  %v3774_v62 = vld [vmem:[%s4730_s1 + $0x80] sm:$0xff]   ;;  %v3776_v63 = vld [vmem:[%s4730_s1 + $0x138] sm:$0xff]   ;;  %vm104_vm9 = vcmp.lt.s32.totalorder %v4170_v2, 8  ;;  %vm4744_vm10 = vcmp.ge.s32.totalorder %v4170_v2, 120  ;;  %v3788_v48 = vld [vmem:[%s4730_s1 + $0x108] sm:$0xff]  }
  0x19   :  { %3647 = vrot.lane.b32.xlu1 %v3646_v21, %s3930_s19  ;;  %3637 = vrot.lane.b32.xlu0 %v3646_v21, %s3931_s20  ;;  %vm4111_vm6 = vcmp.eq.s32.totalorder %v64_v45, 0  ;;  %vm137_vm11 = vmor %vm3984_vm0, %vm104_vm9  ;;  %v3781_v5 = vld [vmem:[%s4730_s1 + $0xe0] sm:$0xff]   ;;  %v3783_v42 = vld [vmem:[%s4730_s1 + $0xd8] sm:$0xff]  }
  0x1a   :  { %3268 = vmatpush3.bf16.msra.mxu0 %v3753_v25  ;;  %vm2687_vm7 = vmneg %vm4111_vm6  ;;  %v3786_v45 = vld [vmem:[%s4730_s1 + $0x110] sm:$0xff]   ;;  %v3852_v8 = vld [vmem:[#allocation2 + $0xe0] sm:$0xff]  }
  0x1b   :  { %3269 = vmatprep.subr.bf16.mxu0 %v3754_v32  ;;  %3288 = vmatpush3.bf16.msra.mxu1 %v3763_v38  ;;  %vm4130_vm8 = vmpackc.low %vm4739_vm4, %vm2687_vm7  ;;  %v3780_v38 = vld [vmem:[%s4730_s1 + $0x128] sm:$0xff]   ;;  %v3809_v0 = vld [vmem:[%s4730_s1 + $0x1f0] sm:$0xff]  }
  0x1c   :  { %3289 = vmatprep.subr.bf16.mxu1 %v3765_v43  ;;  %vm390_vm12 = vmor %vm3984_vm0, %vm4744_vm10  ;;  %v3854_v7 = vld [vmem:[#allocation2 + $0xd8] sm:$0xff]   ;;  %v3855_v9 = vld [vmem:[#allocation2 + $0x120] sm:$0xff]  }
  0x1d   :  { %3652 = vrot.lane.b32.xlu0 %v3651_v29, %s3931_s20  ;;  %3657 = vrot.lane.b32.xlu1 %v3656_v30, %s3931_s20  ;;  %vm139_vm13 = vmor %vm4111_vm6, %vm104_vm9 }
  0x1e   :  { %3270 = vmatpush3.bf16.msra.mxu0 %v3754_v32  ;;  %vm392_vm14 = vmor %vm4111_vm6, %vm4744_vm10 }
  0x1f   :  { %3271 = vmatprep.subr.bf16.mxu0 %v3755_v37  ;;  %3290 = vmatpush3.bf16.msra.mxu1 %v3765_v43  ;;  %vm4192_vm15 = vmneg %vm104_vm9  ;;  %v3784_v43 = vld [vmem:[%s4730_s1 + $0x118] sm:$0xff]  }
  0x20   :  { %3291 = vmatprep.subr.bf16.mxu1 %v3767_v46  ;;  %vm2700_vm2 = vmneg %vm137_vm11 }
  0x21   :  { %3662 = vrot.lane.b32.xlu0 %v3651_v29, %s3930_s19  ;;  %3667 = vrot.lane.b32.xlu1 %v3656_v30, %s3930_s19  ;;  %vm4198_vm0 = vmneg %vm4744_vm10  ;;  %v3777_v29 = vld [vmem:[%s4730_s1 + $0xf0] sm:$0xff]  }
  0x22   :  { %3272 = vmatpush3.bf16.msra.mxu0 %v3755_v37  ;;  %vm2734_vm7 = vmneg %vm390_vm12  ;;  %v3778_v30 = vld [vmem:[%s4730_s1 + $0x130] sm:$0xff]   ;;  %v3779_v37 = vld [vmem:[%s4730_s1 + $0xe8] sm:$0xff]  }
  0x23   :  { %3273 = vmatprep.subr.bf16.mxu0 %v3756_v41  ;;  %3292 = vmatpush3.bf16.msra.mxu1 %v3767_v46  ;;  %vm2705_vm3 = vmneg %vm139_vm13  ;;  %v43_v46 = vadd.s32 8, %v3981_v1 }
  0x24   :  { %3293 = vmatprep.subr.bf16.mxu1 %v3769_v49  ;;  %vm2739_vm1 = vmneg %vm392_vm14 }
  0x25   :  { %3672 = vrot.lane.b32.xlu0 %v3671_v39, %s3931_s20  ;;  %3677 = vrot.lane.b32.xlu1 %v3676_v40, %s3931_s20  ;;  %vm4204_vm4 = vmpackc.low %vm4192_vm15, %vm2700_vm2 }
  0x26   :  { %3274 = vmatpush3.bf16.msra.mxu0 %v3756_v41  ;;  %vm4210_vm6 = vmpackc.low %vm4198_vm0, %vm2734_vm7  ;;  %v3782_v41 = vld [vmem:[%s4730_s1 + $0x120] sm:$0xff]  }
  0x27   :  { %3275 = vmatprep.subr.bf16.mxu0 %v3757_v44  ;;  %3294 = vmatpush3.bf16.msra.mxu1 %v3769_v49  ;;  %vm4216_vm11 = vmpackc.low %vm4192_vm15, %vm2705_vm3 }
  0x28   :  { %3295 = vmatprep.subr.bf16.mxu1 %v3771_v52  ;;  %vm4222_vm12 = vmpackc.low %vm4198_vm0, %vm2739_vm1 }
  0x29   :  { %3682 = vrot.lane.b32.xlu0 %v3671_v39, %s3930_s19  ;;  %3687 = vrot.lane.b32.xlu1 %v3676_v40, %s3930_s19  ;;  %vm4229_vm13 = vmpackc.low %vm4192_vm15, %vm4192_vm15 }
  0x2a   :  { %3276 = vmatpush3.bf16.msra.mxu0 %v3757_v44  ;;  %v4768_v16 = vsel %vm4229_vm13, 4294967295, %v4767_v16  ;;  %v3785_v44 = vld [vmem:[%s4730_s1 + $0xd0] sm:$0xff]   ;;  %vm4324_vm2 = vmpackc.low %vm4198_vm0, %vm4198_vm0 }
  0x2b   :  { %3277 = vmatprep.subr.bf16.mxu0 %v3758_v47  ;;  %3296 = vmatpush3.bf16.msra.mxu1 %v3771_v52  ;;  %v3789_v52 = vld [vmem:[%s4730_s1 + $0xc0] sm:$0xff]  }
  0x2c   :  { %3297 = vmatprep.subr.bf16.mxu1 %v3773_v55 }
  0x2e   :  { %3278 = vmatpush3.bf16.msra.mxu0 %v3758_v47  ;;  %v3787_v47 = vld [vmem:[%s4730_s1 + $0xc8] sm:$0xff]  }
  0x2f   :  { %3303 = vmatprep.subr.bf16.mxu0 %v3760_v50  ;;  %3298 = vmatpush3.bf16.msra.mxu1 %v3773_v55  ;;  %v3886_v55 = vld [vmem:[#allocation2 + $0x1d8] sm:$0xff]  }
  0x30   :  { %3323 = vmatprep.subr.bf16.mxu1 %v4148_v57 }
  0x31   :  { %3280 = vmatmul.mubr.msk.bf16.vlgmr.msra.gmra.mxu0 %vm4130_vm8, %v2689_v51 }
  0x32   :  { %3304 = vmatpush3.bf16.msra.mxu0 %v3760_v50  ;;  %v57_v50 = vand.u32 15, %v43_v46 }
  0x33   :  { %3305 = vmatprep.subr.bf16.mxu0 %v3762_v54 }
  0x34   :  { %vm4289_vm1 = vcmp.eq.s32.totalorder %v57_v50, 15  ;;  %v3807_v50 = vld [vmem:[%s4730_s1 + $0x1f8] sm:$0xff]  }
  0x35   :  { %vm4303_vm3 = vmor %vm4289_vm1, %vm104_vm9 }
  0x36   :  { %3306 = vmatpush3.bf16.msra.mxu0 %v3762_v54  ;;  %v3790_v54 = vld [vmem:[%s4730_s1 + $0x100] sm:$0xff]   ;;  %vm2859_vm14 = vmneg %vm4303_vm3 }
  0x37   :  { %3307 = vmatprep.subr.bf16.mxu0 %v3764_v56  ;;  %vm4332_vm7 = vmpackc.low %vm2859_vm14, %vm4192_vm15 }
  0x3a   :  { %3308 = vmatpush3.bf16.msra.mxu0 %v3764_v56 }
  0x3b   :  { %3309 = vmatprep.subr.bf16.mxu0 %v3766_v58 }
  0x3e   :  { %3310 = vmatpush3.bf16.msra.mxu0 %v3766_v58 }
  0x3f   :  { %3311 = vmatprep.subr.bf16.mxu0 %v3768_v59 }
  0x42   :  { %3312 = vmatpush3.bf16.msra.mxu0 %v3768_v59  ;;  %v3791_v59 = vld [vmem:[%s4730_s1 + $0x178] sm:$0xff]  }
  0x43   :  { %3313 = vmatprep.subr.bf16.mxu0 %v3770_v60 }
  0x46   :  { %3314 = vmatpush3.bf16.msra.mxu0 %v3770_v60  ;;  %v3792_v60 = vld [vmem:[%s4730_s1 + $0x1b8] sm:$0xff]  }
  0x47   :  { %3315 = vmatprep.subr.bf16.mxu0 %v3772_v61 }
  0x4a   :  { %3316 = vmatpush3.bf16.msra.mxu0 %v3772_v61 }
  0x4b   :  { %3317 = vmatprep.subr.bf16.mxu0 %v3774_v62 }
  0x4e   :  { %3318 = vmatpush3.bf16.msra.mxu0 %v3774_v62 }
  0x4f   :  { %3343 = vmatprep.subr.bf16.mxu0 %v3776_v63 }
  0x87   :  { %v3643_v10 = vpop.permute.xlu1 %3642  ;;  %v3633_v11 = vpop.permute.xlu0 %3632 }
  0x88   :  { %v3645_v12 = vunpack.i.h.bf16 %v3643_v10  ;;  %v3644_v13 = vunpack.i.l.bf16 %v3643_v10  ;;  %v3635_v14 = vunpack.i.h.bf16 %v3633_v11  ;;  %v3634_v15 = vunpack.i.l.bf16 %v3633_v11 }
  0x8a   :  { %v2736_v17 = vpack.c.bf16 %v3645_v12, %v3644_v13  ;;  %v2702_v18 = vpack.c.bf16 %v3635_v14, %v3634_v15  ;;  %v3899_v13 = vld [vmem:[%s4729_s0 + $0x18] sm:$0xff]  ;;  %v3900_v14 = vld [vmem:[%s4729_s0 + $0x10] sm:$0xff] }
  0x8b   :  { %v3648_v19 = vpop.permute.xlu1 %3647  ;;  %v3638_v20 = vpop.permute.xlu0 %3637  ;;  %v651_v15 = vpack.c.bf16 %v3899_v13, %v3900_v14  ;;  %v3816_v13 = vld [vmem:[%s4730_s1 + $0x218] sm:$0xff]   ;;  %v3817_v14 = vld [vmem:[%s4730_s1 + $0x1d0] sm:$0xff]  }
  0x8c   :  { %v3650_v21 = vunpack.i.h.bf16 %v3648_v19  ;;  %v3649_v22 = vunpack.i.l.bf16 %v3648_v19  ;;  %v3640_v24 = vunpack.i.h.bf16 %v3638_v20  ;;  %v3639_v25 = vunpack.i.l.bf16 %v3638_v20  ;;  %3299 = vmatprep.mubr.msk.bf16.mxu1 %vm4204_vm4, %v2702_v18  ;;  %3319 = vmatprep.mubr.msk.bf16.mxu0 %vm4210_vm6, %v2736_v17  ;;  %v3793_v17 = vld [vmem:[%s4730_s1 + $0x170] sm:$0xff]  }
  0x8d   :  { %v3794_v18 = vld [vmem:[%s4730_s1 + $0x1b0] sm:$0xff]  }
  0x8e   :  { %v2741_v31 = vpack.c.bf16 %v3650_v21, %v3649_v22  ;;  %v2707_v32 = vpack.c.bf16 %v3640_v24, %v3639_v25  ;;  %v4775_v22 = vmov 0  ;;  %v3795_v24 = vld [vmem:[%s4730_s1 + $0x168] sm:$0xff]   ;;  %v3884_v21 = vld [vmem:[#allocation2 + $0x1e0] sm:$0xff]  }
  0x8f   :  { %v3653_v33 = vpop.permute.xlu0 %3652  ;;  %v3658_v51 = vpop.permute.xlu1 %3657  ;;  %v4776_v22 = vsel %vm4332_vm7, 4294967295, %v4775_v22  ;;  %v3796_v25 = vld [vmem:[%s4730_s1 + $0x1a8] sm:$0xff]  }
  0x90   :  { %3300 = vmatmul.mubr.msk.bf16.vlgmr.msra.gmra.mxu1 %vm4216_vm11, %v2707_v32  ;;  %3320 = vmatmul.mubr.msk.bf16.vlgmr.msra.gmra.mxu0 %vm4222_vm12, %v2741_v31  ;;  %v3655_v39 = vunpack.i.h.bf16 %v3653_v33  ;;  %v3654_v40 = vunpack.i.l.bf16 %v3653_v33  ;;  %v3660_v56 = vunpack.i.h.bf16 %v3658_v51  ;;  %v3799_v31 = vld [vmem:[%s4730_s1 + $0x158] sm:$0xff]   ;;  %v45_v33 = vadd.s32 24, %v3981_v1 }
  0x91   :  { %3324 = vmatpush3.bf16.msra.mxu1 %v4148_v57  ;;  %3344 = vmatpush3.bf16.msra.mxu0 %v3776_v63  ;;  %v3659_v57 = vunpack.i.l.bf16 %v3658_v51  ;;  %v3800_v32 = vld [vmem:[%s4730_s1 + $0x198] sm:$0xff]  }
  0x92   :  { %3325 = vmatprep.subr.bf16.mxu1 %v3777_v29  ;;  %3345 = vmatprep.subr.bf16.mxu0 %v3778_v30  ;;  %v2770_v4 = vpack.c.bf16 %v3655_v39, %v3654_v40  ;;  %v3803_v40 = vld [vmem:[%s4730_s1 + $0x148] sm:$0xff]   ;;  %v3808_v51 = vld [vmem:[%s4730_s1 + $0x238] sm:$0xff]  }
  0x93   :  { %3359 = vmatprep.mubr.bf16.mxu0 %v650_v34  ;;  %v3663_v49 = vpop.permute.xlu0 %3662  ;;  %v2775_v12 = vpack.c.bf16 %v3660_v56, %v3659_v57  ;;  %v3801_v34 = vld [vmem:[%s4730_s1 + $0x150] sm:$0xff]   ;;  %v3668_v39 = vpop.permute.xlu1 %3667 }
  0x94   :  { %3339 = vmatprep.mubr.msk.bf16.mxu1 %vm4229_vm13, %v2770_v4  ;;  %v3665_v62 = vunpack.i.h.bf16 %v3663_v49  ;;  %v3664_v63 = vunpack.i.l.bf16 %v3663_v49  ;;  %v3804_v4 = vld [vmem:[%s4730_s1 + $0x188] sm:$0xff]   ;;  %v3669_v46 = vunpack.i.l.bf16 %v3668_v39 }
  0x95   :  { %3326 = vmatpush3.bf16.msra.mxu1 %v3777_v29  ;;  %3346 = vmatpush3.bf16.msra.mxu0 %v3778_v30  ;;  %v3797_v29 = vld [vmem:[%s4730_s1 + $0x160] sm:$0xff]  }
  0x96   :  { %3327 = vmatprep.subr.bf16.mxu1 %v3779_v37  ;;  %3347 = vmatprep.subr.bf16.mxu0 %v3780_v38  ;;  %v2828_v19 = vpack.c.bf16 %v3665_v62, %v3664_v63  ;;  %v3798_v30 = vld [vmem:[%s4730_s1 + $0x1a0] sm:$0xff]   ;;  %v2895_v62 = vpack.c.bf16 %v4074_v35, %v4078_v36  ;;  %v4788_v63 = vmov 0  ;;  %v3811_v35 = vld [vmem:[%s4730_s1 + $0x1e8] sm:$0xff]  }
  0x97   :  { %v3673_v58 = vpop.permute.xlu0 %3672  ;;  %v3812_v36 = vld [vmem:[%s4730_s1 + $0x228] sm:$0xff]  }
  0x98   :  { %v3675_v10 = vunpack.i.h.bf16 %v3673_v58  ;;  %v3674_v11 = vunpack.i.l.bf16 %v3673_v58 }
  0x99   :  { %3328 = vmatpush3.bf16.msra.mxu1 %v3779_v37  ;;  %3348 = vmatpush3.bf16.msra.mxu0 %v3780_v38  ;;  %v3802_v37 = vld [vmem:[%s4730_s1 + $0x190] sm:$0xff]   ;;  %v71_v38 = vand.u32 15, %v45_v33 }
  0x9a   :  { %3329 = vmatprep.subr.bf16.mxu1 %v3781_v5  ;;  %3349 = vmatprep.subr.bf16.mxu0 %v3782_v41  ;;  %v2862_v20 = vpack.c.bf16 %v3675_v10, %v3674_v11  ;;  %v3813_v10 = vld [vmem:[%s4730_s1 + $0x1e0] sm:$0xff]  }
  0x9b   :  { %vm4371_vm3 = vcmp.eq.s32.totalorder %v71_v38, 15  ;;  %v3683_v49 = vpop.permute.xlu0 %3682  ;;  %v3814_v11 = vld [vmem:[%s4730_s1 + $0x220] sm:$0xff]  }
  0x9c   :  { %vm4379_vm14 = vmor %vm4371_vm3, %vm104_vm9  ;;  %v3685_v56 = vunpack.i.h.bf16 %v3683_v49  ;;  %v3684_v57 = vunpack.i.l.bf16 %v3683_v49 }
  0x9d   :  { %3330 = vmatpush3.bf16.msra.mxu1 %v3781_v5  ;;  %3350 = vmatpush3.bf16.msra.mxu0 %v3782_v41  ;;  %v3678_v41 = vpop.permute.xlu1 %3677  ;;  %vm2864_vm9 = vmneg %vm4379_vm14 }
  0x9e   :  { %3331 = vmatprep.subr.bf16.mxu1 %v3783_v42  ;;  %3351 = vmatprep.subr.bf16.mxu0 %v3784_v43  ;;  %vm4407_vm14 = vmpackc.low %vm2864_vm9, %vm4192_vm15  ;;  %v2928_v61 = vpack.c.bf16 %v3685_v56, %v3684_v57  ;;  %vm4785_vm15 = vmmov 1  }
  0xa1   :  { %3332 = vmatpush3.bf16.msra.mxu1 %v3783_v42  ;;  %3352 = vmatpush3.bf16.msra.mxu0 %v3784_v43  ;;  %v3805_v43 = vld [vmem:[%s4730_s1 + $0x140] sm:$0xff]  }
  0xa2   :  { %3333 = vmatprep.subr.bf16.mxu1 %v3785_v44  ;;  %3353 = vmatprep.subr.bf16.mxu0 %v3786_v45 }
  0xa5   :  { %3334 = vmatpush3.bf16.msra.mxu1 %v3785_v44  ;;  %3354 = vmatpush3.bf16.msra.mxu0 %v3786_v45  ;;  %v3806_v44 = vld [vmem:[%s4730_s1 + $0x180] sm:$0xff]   ;;  %v3670_v45 = vunpack.i.h.bf16 %v3668_v39 }
  0xa6   :  { %3335 = vmatprep.subr.bf16.mxu1 %v3787_v47  ;;  %3355 = vmatprep.subr.bf16.mxu0 %v3788_v48 }
  0xa7   :  { %v2833_v58 = vpack.c.bf16 %v3670_v45, %v3669_v46 }
  0xa9   :  { %3336 = vmatpush3.bf16.msra.mxu1 %v3787_v47  ;;  %3356 = vmatpush3.bf16.msra.mxu0 %v3788_v48  ;;  %v3680_v47 = vunpack.i.h.bf16 %v3678_v41  ;;  %v3679_v48 = vunpack.i.l.bf16 %v3678_v41 }
  0xaa   :  { %3337 = vmatprep.subr.bf16.mxu1 %v3789_v52  ;;  %3357 = vmatprep.subr.bf16.mxu0 %v3790_v54 }
  0xad   :  { %3338 = vmatpush3.bf16.msra.mxu1 %v3789_v52  ;;  %3358 = vmatpush3.bf16.msra.mxu0 %v3790_v54  ;;  %v4783_v54 = vmov 0 }
  0xae   :  { %3363 = vmatprep.subr.bf16.mxu1 %v3791_v59  ;;  %3383 = vmatprep.subr.bf16.mxu0 %v3792_v60  ;;  %v4784_v54 = vsel %vm4407_vm14, 4294967295, %v4783_v54 }
  0xb0   :  { %3340 = vmatmul.mubr.msk.bf16.vlgmr.msra.gmra.mxu1 %vm4229_vm13, %v2775_v12  ;;  %3360 = vmatmul.mubr.bf16.vlgmr.msra.gmra.mxu0 %v651_v15  ;;  %vm2893_vm13 = vmneg %vm4289_vm1  ;;  %v3815_v12 = vld [vmem:[%s4730_s1 + $0x1d8] sm:$0xff]   ;;  %v3818_v15 = vld [vmem:[%s4730_s1 + $0x210] sm:$0xff]  }
  0xb1   :  { %3364 = vmatpush3.bf16.msra.mxu1 %v3791_v59  ;;  %3384 = vmatpush3.bf16.msra.mxu0 %v3792_v60  ;;  %v2867_v59 = vpack.c.bf16 %v3680_v47, %v3679_v48  ;;  %v3810_v60 = vld [vmem:[%s4730_s1 + $0x230] sm:$0xff]   ;;  %vm4422_vm9 = vmpackc.low %vm2893_vm13, %vm4785_vm15 }
  0xb2   :  { %3365 = vmatprep.subr.bf16.mxu1 %v3793_v17  ;;  %3385 = vmatprep.subr.bf16.mxu0 %v3794_v18 }
  0xb3   :  { %3379 = vmatprep.mubr.msk.bf16.mxu1 %vm4324_vm2, %v2828_v19  ;;  %3399 = vmatprep.mubr.msk.bf16.mxu0 %vm4332_vm7, %v2862_v20  ;;  %vm4401_vm7 = vmor %vm4289_vm1, %vm4744_vm10  ;;  %v3688_v19 = vpop.permute.xlu1 %3687  ;;  %v3821_v20 = vld [vmem:[%s4730_s1 + $0x1c0] sm:$0xff]  }
  0xb4   :  { %vm2925_vm10 = vmneg %vm4401_vm7 }
  0xb5   :  { %3366 = vmatpush3.bf16.msra.mxu1 %v3793_v17  ;;  %3386 = vmatpush3.bf16.msra.mxu0 %v3794_v18  ;;  %vm4434_vm1 = vmpackc.low %vm2925_vm10, %vm4198_vm0  ;;  %v3819_v17 = vld [vmem:[%s4730_s1 + $0x1c8] sm:$0xff]   ;;  %vm4790_vm10 = vcmp.ge.s32.totalorder %v4170_v2, 120 }
  0xb6   :  { %3367 = vmatprep.subr.bf16.mxu1 %v3795_v24  ;;  %3387 = vmatprep.subr.bf16.mxu0 %v3796_v25  ;;  %v4789_v63 = vsel %vm4434_vm1, 4294967295, %v4788_v63  ;;  %v3820_v18 = vld [vmem:[%s4730_s1 + $0x208] sm:$0xff]   ;;  %vm1190_vm13 = vmor %vm4371_vm3, %vm4790_vm10 }
  0xb7   :  { %vm2897_vm7 = vmneg %vm4371_vm3 }
  0xb9   :  { %3368 = vmatpush3.bf16.msra.mxu1 %v3795_v24  ;;  %3388 = vmatpush3.bf16.msra.mxu0 %v3796_v25  ;;  %v3822_v24 = vld [vmem:[%s4730_s1 + $0x200] sm:$0xff]   ;;  %v3690_v25 = vunpack.i.h.bf16 %v3688_v19  ;;  %s3933_s1 = smov 16  }
  0xba   :  { %3369 = vmatprep.subr.bf16.mxu1 %v3797_v29  ;;  %3389 = vmatprep.subr.bf16.mxu0 %v3798_v30 }
  0xbd   :  { %3370 = vmatpush3.bf16.msra.mxu1 %v3797_v29  ;;  %3390 = vmatpush3.bf16.msra.mxu0 %v3798_v30  ;;  %v3689_v29 = vunpack.i.l.bf16 %v3688_v19 }
  0xbe   :  { %3371 = vmatprep.subr.bf16.mxu1 %v3799_v31  ;;  %3391 = vmatprep.subr.bf16.mxu0 %v3800_v32 }
  0xbf   :  { %v2933_v30 = vpack.c.bf16 %v3690_v25, %v3689_v29 }
  0xc1   :  { %3372 = vmatpush3.bf16.msra.mxu1 %v3799_v31  ;;  %3392 = vmatpush3.bf16.msra.mxu0 %v3800_v32 }
  0xc2   :  { %3373 = vmatprep.subr.bf16.mxu1 %v3801_v34  ;;  %3393 = vmatprep.subr.bf16.mxu0 %v3802_v37 }
  0xc5   :  { %3374 = vmatpush3.bf16.msra.mxu1 %v3801_v34  ;;  %3394 = vmatpush3.bf16.msra.mxu0 %v3802_v37 }
  0xc6   :  { %3375 = vmatprep.subr.bf16.mxu1 %v3803_v40  ;;  %3395 = vmatprep.subr.bf16.mxu0 %v3804_v4 }
  0xc9   :  { %3376 = vmatpush3.bf16.msra.mxu1 %v3803_v40  ;;  %3396 = vmatpush3.bf16.msra.mxu0 %v3804_v4 }
  0xca   :  { %3377 = vmatprep.subr.bf16.mxu1 %v3805_v43  ;;  %3397 = vmatprep.subr.bf16.mxu0 %v3806_v44 }
  0xcd   :  { %3378 = vmatpush3.bf16.msra.mxu1 %v3805_v43  ;;  %3398 = vmatpush3.bf16.msra.mxu0 %v3806_v44 }
  0xce   :  { %3403 = vmatprep.subr.bf16.mxu1 %v3807_v50  ;;  %3423 = vmatprep.subr.bf16.mxu0 %v3808_v51 }
  0xd0   :  { %3380 = vmatmul.mubr.msk.bf16.vlgmr.msra.gmra.mxu1 %vm4324_vm2, %v2833_v58  ;;  %3400 = vmatmul.mubr.msk.bf16.vlgmr.msra.gmra.mxu0 %vm4407_vm14, %v2867_v59  ;;  %vm4485_vm14 = vmpackc.low %vm2897_vm7, %vm4785_vm15 }
  0xd1   :  { %3404 = vmatpush3.bf16.msra.mxu1 %v3807_v50  ;;  %3424 = vmatpush3.bf16.msra.mxu0 %v3808_v51 }
  0xd2   :  { %3405 = vmatprep.subr.bf16.mxu1 %v3809_v0  ;;  %3425 = vmatprep.subr.bf16.mxu0 %v3810_v60 }
  0xd3   :  { %3419 = vmatprep.mubr.msk.bf16.mxu1 %vm4422_vm9, %v2895_v62  ;;  %3439 = vmatprep.mubr.msk.bf16.mxu0 %vm4434_vm1, %v2928_v61  ;;  %vm2930_vm1 = vmneg %vm1190_vm13  ;;  %vm4799_vm13 = vcmp.lt.s32.totalorder %v3981_v1, 7 }
  0xd4   :  { %vm4491_vm10 = vmpackc.low %vm2930_vm1, %vm4198_vm0  ;;  %vm4795_vm0 = vcmp.lt.s32.totalorder %v3981_v1, 1 }
  0xd5   :  { %3406 = vmatpush3.bf16.msra.mxu1 %v3809_v0  ;;  %3426 = vmatpush3.bf16.msra.mxu0 %v3810_v60  ;;  %vm4796_vm3 = vmmov %vm4795_vm0 }
  0xd6   :  { %3407 = vmatprep.subr.bf16.mxu1 %v3811_v35  ;;  %3427 = vmatprep.subr.bf16.mxu0 %v3812_v36  ;;  %vm4797_vm15 = vmmov %vm4795_vm0 }
  0xd7   :  { %vm4798_vm1 = vmmov %vm4795_vm0 }
  0xd8   :  { %vm4800_vm7 = vmmov %vm4799_vm13 }
  0xd9   :  { %3408 = vmatpush3.bf16.msra.mxu1 %v3811_v35  ;;  %3428 = vmatpush3.bf16.msra.mxu0 %v3812_v36 }
  0xda   :  { %3409 = vmatprep.subr.bf16.mxu1 %v3813_v10  ;;  %3429 = vmatprep.subr.bf16.mxu0 %v3814_v11 }
  0xdd   :  { %3410 = vmatpush3.bf16.msra.mxu1 %v3813_v10  ;;  %3430 = vmatpush3.bf16.msra.mxu0 %v3814_v11 }
  0xde   :  { %3411 = vmatprep.subr.bf16.mxu1 %v3815_v12  ;;  %3431 = vmatprep.subr.bf16.mxu0 %v3816_v13 }
  0xe1   :  { %3412 = vmatpush3.bf16.msra.mxu1 %v3815_v12  ;;  %3432 = vmatpush3.bf16.msra.mxu0 %v3816_v13 }
  0xe2   :  { %3413 = vmatprep.subr.bf16.mxu1 %v3817_v14  ;;  %3433 = vmatprep.subr.bf16.mxu0 %v3818_v15 }
  0xe5   :  { %3414 = vmatpush3.bf16.msra.mxu1 %v3817_v14  ;;  %3434 = vmatpush3.bf16.msra.mxu0 %v3818_v15 }
  0xe6   :  { %3415 = vmatprep.subr.bf16.mxu1 %v3819_v17  ;;  %3435 = vmatprep.subr.bf16.mxu0 %v3820_v18 }
  0xe9   :  { %3416 = vmatpush3.bf16.msra.mxu1 %v3819_v17  ;;  %3436 = vmatpush3.bf16.msra.mxu0 %v3820_v18 }
  0xea   :  { %3417 = vmatprep.subr.bf16.mxu1 %v3821_v20  ;;  %3437 = vmatprep.subr.bf16.mxu0 %v3822_v24 }
  0xed   :  { %3418 = vmatpush3.bf16.msra.mxu1 %v3821_v20  ;;  %3438 = vmatpush3.bf16.msra.mxu0 %v3822_v24 }
  0xf0   :  { %3420 = vmatmul.mubr.msk.bf16.vlgmr.msra.gmra.mxu1 %vm4485_vm14, %v2899_v28  ;;  %3440 = vmatmul.mubr.msk.bf16.vlgmr.msra.gmra.mxu0 %vm4491_vm10, %v2933_v30 }
  0xf1   :  { %v3281_v32 = vpop.f32.mrf.mxu0 }
  0xf3   :  { %v268_v33 = vpop.f32.mrf.mxu0 }
  0xf5   :  { %v3282_v34 = vpop.f32.mrf.mxu0 }
  0xf7   :  { %v271_v37 = vpop.f32.mrf.mxu0 }
 0x150   :  { %v3301_v38 = vpop.f32.mrf.mxu1  ;;  %v3321_v39 = vpop.f32.mrf.mxu0 }
 0x151   :  { %v374_v51 = vadd.f32 %v3301_v38, %v3281_v32 }
 0x152   :  { %v365_v3 = vpop.f32.mrf.mxu1  ;;  %v499_v40 = vpop.f32.mrf.mxu0 }
 0x153   :  { %v366_v48 = vadd.f32 %v365_v3, %v268_v33  ;;  %v516_v0 = vadd.f32 %v3321_v39, %v374_v51 }
 0x154   :  { %v3302_v4 = vpop.f32.mrf.mxu1  ;;  %v3322_v5 = vpop.f32.mrf.mxu0 }
 0x155   :  { %v514_v52 = vadd.f32 %v499_v40, %v366_v48  ;;  %v377_v56 = vadd.f32 %v3302_v4, %v3282_v34 }
 0x156   :  { %v368_v41 = vpop.f32.mrf.mxu1  ;;  %v502_v42 = vpop.f32.mrf.mxu0 }
 0x157   :  { %v369_v57 = vadd.f32 %v368_v41, %v271_v37  ;;  %v517_v61 = vadd.f32 %v3322_v5, %v377_v56 }
 0x159   :  { %v515_v62 = vadd.f32 %v502_v42, %v369_v57 }
 0x170   :  { %v3341_v43 = vpop.f32.mrf.mxu1  ;;  %v3361_v26 = vpop.f32.mrf.mxu0 }
 0x171   :  { %v648_v35 = vadd.f32 %v3341_v43, %v516_v0 }
 0x172   :  { %v631_v27 = vpop.f32.mrf.mxu1  ;;  %v751_v44 = vpop.f32.mrf.mxu0 }
 0x173   :  { %v646_v60 = vadd.f32 %v631_v27, %v514_v52  ;;  %v768_v14 = vadd.f32 %v3361_v26, %v648_v35 }
 0x174   :  { %v3342_v28 = vpop.f32.mrf.mxu1  ;;  %v3362_v45 = vpop.f32.mrf.mxu0 }
 0x175   :  { %v766_v11 = vadd.f32 %v751_v44, %v646_v60  ;;  %v649_v12 = vadd.f32 %v3342_v28, %v517_v61 }
 0x176   :  { %v634_v46 = vpop.f32.mrf.mxu1  ;;  %v754_v47 = vpop.f32.mrf.mxu0 }
 0x177   :  { %v647_v13 = vadd.f32 %v634_v46, %v515_v62  ;;  %v769_v19 = vadd.f32 %v3362_v45, %v649_v12 }
 0x179   :  { %v767_v20 = vadd.f32 %v754_v47, %v647_v13 }
 0x190   :  { %v3381_v49 = vpop.f32.mrf.mxu1  ;;  %v3401_v50 = vpop.f32.mrf.mxu0 }
 0x191   :  { %v900_v24 = vadd.f32 %v3381_v49, %v768_v14 }
 0x192   :  { %v883_v58 = vpop.f32.mrf.mxu1  ;;  %v1036_v59 = vpop.f32.mrf.mxu0 }
 0x193   :  { %v898_v15 = vadd.f32 %v883_v58, %v766_v11  ;;  %v1053_v38 = vadd.f32 %v3401_v50, %v900_v24 }
 0x194   :  { %v3382_v36 = vpop.f32.mrf.mxu1  ;;  %v3402_v10 = vpop.f32.mrf.mxu0 }
 0x195   :  { %v1051_v30 = vadd.f32 %v1036_v59, %v898_v15  ;;  %v901_v32 = vadd.f32 %v3382_v36, %v769_v19 }
 0x196   :  { %v886_v17 = vpop.f32.mrf.mxu1  ;;  %v1039_v18 = vpop.f32.mrf.mxu0 }
 0x197   :  { %v899_v33 = vadd.f32 %v886_v17, %v767_v20  ;;  %v1054_v4 = vadd.f32 %v3402_v10, %v901_v32 }
 0x199   :  { %v1052_v5 = vadd.f32 %v1039_v18, %v899_v33  ;;  %v3823_v33 = vld [vmem:[#allocation2 + $0x78] sm:$0xff]  }
 0x19a   :  { %3443 = vmatprep.subr.bf16.mxu1 %v3823_v33 }
 0x19b   :  { %3444 = vmatpush3.bf16.msra.mxu1 %v3823_v33 }
 0x1b0   :  { %v3421_v25 = vpop.f32.mrf.mxu1  ;;  %v3441_v29 = vpop.f32.mrf.mxu0 }
 0x1b1   :  { %v1177_v41 = vadd.f32 %v3421_v25, %v1053_v38 }
 0x1b2   :  { %v1160_v34 = vpop.f32.mrf.mxu1  ;;  %v1296_v37 = vpop.f32.mrf.mxu0 }
 0x1b3   :  { %v1175_v39 = vadd.f32 %v1160_v34, %v1051_v30  ;;  %v4504_v28 = vadd.f32 %v3441_v29, %v1177_v41  ;;  %v3829_v41 = vld [vmem:[#allocation2 + $0x48] sm:$0xff]  }
 0x1b4   :  { %v3422_v3 = vpop.f32.mrf.mxu1  ;;  %v3442_v40 = vpop.f32.mrf.mxu0 }
 0x1b5   :  { %v4502_v43 = vadd.f32 %v1296_v37, %v1175_v39  ;;  %v1178_v26 = vadd.f32 %v3422_v3, %v1054_v4  ;;  %v1328_v50 = vmul.f32 %v4504_v28, %v4504_v28  ;;  %v3824_v39 = vld [vmem:[#allocation2 + $0x70] sm:$0xff]   ;;  %v3825_v3 = vld [vmem:[#allocation2 + $0x68] sm:$0xff]   ;;  %v3827_v4 = vld [vmem:[#allocation2 + $0x58] sm:$0xff]  }
 0x1b6   :  { %v1163_v42 = vpop.f32.mrf.mxu1  ;;  %v1299_v44 = vpop.f32.mrf.mxu0  ;;  %3445 = vmatprep.subr.bf16.mxu1 %v3824_v39 }
 0x1b7   :  { %v1176_v27 = vadd.f32 %v1163_v42, %v1052_v5  ;;  %v1326_v46 = vmul.f32 %v4502_v43, %v4502_v43  ;;  %v4510_v47 = vadd.f32 %v3442_v40, %v1178_v26  ;;  %3446 = vmatpush3.bf16.msra.mxu1 %v3824_v39  ;;  %v3826_v40 = vld [vmem:[#allocation2 + $0x60] sm:$0xff]   ;;  %v3828_v5 = vld [vmem:[#allocation2 + $0x50] sm:$0xff]   ;;  %v3831_v26 = vld [vmem:[#allocation2 + $0x38] sm:$0xff]  }
 0x1b8   :  { %3447 = vmatprep.subr.bf16.mxu1 %v3825_v3  ;;  %v3830_v42 = vld [vmem:[#allocation2 + $0x40] sm:$0xff]   ;;  %3463 = vmatprep.subr.bf16.mxu0 %v3831_v26 }
 0x1b9   :  { %v4506_v45 = vadd.f32 %v1299_v44, %v1176_v27  ;;  %v1329_v56 = vmul.f32 %v4510_v47, %v4510_v47  ;;  %v3832_v27 = vld [vmem:[#allocation2 + $0x30] sm:$0xff]   ;;  %v4530_v44 = vld [vmem:[#allocation2 + $0xb8] sm:$0xff]   ;;  %3464 = vmatpush3.bf16.msra.mxu0 %v3831_v26 }
 0x1ba   :  { %3465 = vmatprep.subr.bf16.mxu0 %v3832_v27 }
 0x1bb   :  { %v1317_v48 = vadd.f32 %v4506_v45, %v4502_v43  ;;  %v1327_v49 = vmul.f32 %v4506_v45, %v4506_v45  ;;  %3448 = vmatpush3.bf16.msra.mxu1 %v3825_v3 }
 0x1bc   :  { %3449 = vmatprep.subr.bf16.mxu1 %v3826_v40 }
 0x1bd   :  { %v1318_v51 = vadd.f32 %v1317_v48, %v4504_v28  ;;  %v1330_v52 = vadd.f32 %v1327_v49, %v1326_v46  ;;  %v3834_v46 = vld [vmem:[#allocation2 + $0x28] sm:$0xff]   ;;  %3466 = vmatpush3.bf16.msra.mxu0 %v3832_v27  ;;  %v3836_v48 = vld [vmem:[#allocation2 + $0x20] sm:$0xff]   ;;  %v3838_v49 = vld [vmem:[#allocation2 + $0x18] sm:$0xff]  }
 0x1be   :  { %3467 = vmatprep.subr.bf16.mxu0 %v3834_v46 }
 0x1bf   :  { %v1319_v57 = vadd.f32 %v1318_v51, %v4510_v47  ;;  %v1331_v58 = vadd.f32 %v1330_v52, %v1328_v50  ;;  %3450 = vmatpush3.bf16.msra.mxu1 %v3826_v40  ;;  %v3840_v50 = vld [vmem:[#allocation2 + $0x10] sm:$0xff]   ;;  %v3842_v51 = vld [vmem:[#allocation2 + $0x8] sm:$0xff]  }
 0x1c0   :  { %3451 = vmatprep.subr.bf16.mxu1 %v3827_v4 }
 0x1c1   :  { %v1320_v59 = vrot.slane %v1319_v57, 4  ;;  %v1332_v0 = vadd.f32 %v1331_v58, %v1329_v56  ;;  %3468 = vmatpush3.bf16.msra.mxu0 %v3834_v46 }
 0x1c2   :  { %3469 = vmatprep.subr.bf16.mxu0 %v3836_v48 }
 0x1c3   :  { %v1321_v60 = vadd.f32 %v1320_v59, %v1319_v57  ;;  %v1333_v61 = vrot.slane %v1332_v0, 4  ;;  %3452 = vmatpush3.bf16.msra.mxu1 %v3827_v4 }
 0x1c4   :  { %3453 = vmatprep.subr.bf16.mxu1 %v3828_v5 }
 0x1c5   :  { %v1322_v62 = vrot.slane %v1321_v60, 2  ;;  %v1334_v35 = vadd.f32 %v1333_v61, %v1332_v0  ;;  %3470 = vmatpush3.bf16.msra.mxu0 %v3836_v48 }
 0x1c6   :  { %3471 = vmatprep.subr.bf16.mxu0 %v3838_v49 }
 0x1c7   :  { %v1323_v36 = vadd.f32 %v1322_v62, %v1321_v60  ;;  %v1335_v10 = vrot.slane %v1334_v35, 2  ;;  %3454 = vmatpush3.bf16.msra.mxu1 %v3828_v5 }
 0x1c8   :  { %3455 = vmatprep.subr.bf16.mxu1 %v3829_v41 }
 0x1c9   :  { %v1324_v11 = vrot.slane %v1323_v36, 1  ;;  %v1336_v12 = vadd.f32 %v1335_v10, %v1334_v35  ;;  %3472 = vmatpush3.bf16.msra.mxu0 %v3838_v49  ;;  %v4537_v10 = vsub.s32 0, %v3981_v1 }
 0x1ca   :  { %3473 = vmatprep.subr.bf16.mxu0 %v3840_v50 }
 0x1cb   :  { %v1325_v13 = vadd.f32 %v1324_v11, %v1323_v36  ;;  %v1337_v14 = vrot.slane %v1336_v12, 1  ;;  %3456 = vmatpush3.bf16.msra.mxu1 %v3829_v41  ;;  %v1315_v36 = vld [vmem:[%s4732_s3] sm:$0x1] }
 0x1cc   :  { %3457 = vmatprep.subr.bf16.mxu1 %v3830_v42 }
 0x1cd   :  { %1339 = vrot.lane.b32.xlu0 %v1325_v13, %s3931_s20  ;;  %v1338_v15 = vadd.f32 %v1337_v14, %v1336_v12  ;;  %3474 = vmatpush3.bf16.msra.mxu0 %v3840_v50 }
 0x1ce   :  { %3475 = vmatprep.subr.bf16.mxu0 %v3842_v51 }
 0x1cf   :  { %1352 = vrot.lane.b32.xlu1 %v1338_v15, %s3931_s20  ;;  %3458 = vmatpush3.bf16.msra.mxu1 %v3830_v42 }
 0x1d0   :  { %3483 = vmatprep.subr.bf16.mxu1 %v4530_v44 }
 0x1d1   :  { %3476 = vmatpush3.bf16.msra.mxu0 %v3842_v51 }
 0x23f   :  { %v1340_v17 = vpop.permute.xlu0 %1339 }
 0x240   :  { %v1341_v18 = vadd.f32 %v1340_v17, %v1325_v13  ;;  %v1316_v13 = vld [vmem:[%s4733_s4] sm:$0x1] }
 0x241   :  { %v1353_v19 = vpop.permute.xlu1 %1352 }
 0x242   :  { %v1354_v20 = vadd.f32 %v1353_v19, %v1338_v15  ;;  %1342 = vrot.lane.b32.xlu0 %v1341_v18, %s3933_s1 }
 0x244   :  { %1355 = vrot.lane.b32.xlu1 %v1354_v20, %s3933_s1 }
 0x2b4   :  { %v1343_v24 = vpop.permute.xlu0 %1342 }
 0x2b5   :  { %v1344_v25 = vadd.f32 %v1343_v24, %v1341_v18 }
 0x2b6   :  { %v1356_v29 = vpop.permute.xlu1 %1355 }
 0x2b7   :  { %v1357_v30 = vadd.f32 %v1356_v29, %v1354_v20  ;;  %1345 = vrot.lane.b32.xlu0 %v1344_v25, %s3934_s16  ;;  %v3844_v29 = vld [vmem:[#allocation2] sm:$0xff]  }
 0x2b8   :  { %3477 = vmatprep.subr.bf16.mxu0 %v3844_v29 }
 0x2b9   :  { %1358 = vrot.lane.b32.xlu1 %v1357_v30, %s3934_s16  ;;  %3478 = vmatpush3.bf16.msra.mxu0 %v3844_v29 }
 0x329   :  { %v1346_v32 = vpop.permute.xlu0 %1345 }
 0x32a   :  { %v1347_v34 = vadd.f32 %v1346_v32, %v1344_v25 }
 0x32b   :  { %v1359_v37 = vpop.permute.xlu1 %1358 }
 0x32c   :  { %v1360_v38 = vadd.f32 %v1359_v37, %v1357_v30  ;;  %1348 = vrot.lane.b32.xlu0 %v1347_v34, %s3928_s27 }
 0x32e   :  { %1361 = vrot.lane.b32.xlu1 %v1360_v38, %s3928_s27 }
 0x39e   :  { %v1349_v52 = vpop.permute.xlu0 %1348 }
 0x39f   :  { %v1350_v56 = vadd.f32 %v1349_v52, %v1347_v34 }
 0x3a0   :  { %v1362_v57 = vpop.permute.xlu1 %1361 }
 0x3a1   :  { %v1351_v58 = vmul.f32 0.001953125, %v1350_v56  ;;  %v1363_v59 = vadd.f32 %v1362_v57, %v1360_v38 }
 0x3a3   :  { %v1365_v0 = vmul.f32 %v1351_v58, %v1351_v58  ;;  %v1364_v60 = vmul.f32 0.001953125, %v1363_v59 }
 0x3a5   :  { %v1366_v61 = vsub.f32 %v1364_v60, %v1365_v0 }
 0x3a7   :  { %v1367_v62 = vmax.f32 %v1366_v61, 0.0 }
 0x3a9   :  { %v1368_v35 = vadd.f32 1e-05, %v1367_v62  ;;  %v3837_v62 = vld [vmem:[#allocation2 + $0xa8] sm:$0xff]  }
 0x3ab   :  { %3895 = vrsqrt.f32 %v1368_v35 }
 0x3b8   :  { %v3896_v11 = vpop.eup %3895 }
 0x3b9   :  { %v1370_v12 = vmul.f32 %v3896_v11, %v1315_v36  ;;  %v3841_v36 = vld [vmem:[#allocation2 + $0x98] sm:$0xff]  }
 0x3bb   :  { %v1371_v14 = vmul.f32 %v1370_v12, %v1351_v58  ;;  %v1377_v15 = vrot.slane %v1370_v12, %v4537_v10  ;;  %v3835_v58 = vld [vmem:[#allocation2 + $0xb0] sm:$0xff]  }
 0x3bd   :  { %v1372_v17 = vsub.f32 %v1316_v13, %v1371_v14  ;;  %v1380_v18 = vmul.f32 %v1377_v15, %v4506_v45  ;;  %v1381_v20 = vmul.f32 %v1377_v15, %v4504_v28  ;;  %v1382_v24 = vmul.f32 %v1377_v15, %v4510_v47  ;;  %v4556_v28 = vld [vmem:[#allocation2 + $0xf8] sm:$0xff]   ;;  %v3843_v13 = vld [vmem:[#allocation2 + $0x90] sm:$0xff]   ;;  %v3845_v14 = vld [vmem:[#allocation2 + $0x88] sm:$0xff]  }
 0x3be   :  { %v1379_v25 = vmul.f32 %v1377_v15, %v4502_v43  ;;  %3503 = vmatprep.subr.bf16.mxu0 %v4556_v28  ;;  %v3846_v15 = vld [vmem:[#allocation2 + $0x80] sm:$0xff]  }
 0x3bf   :  { %v1387_v19 = vrot.slane %v1372_v17, %v4537_v10  ;;  %v3849_v17 = vld [vmem:[#allocation2 + $0x138] sm:$0xff]  }
 0x3c1   :  { %v1390_v30 = vadd.f32 %v1387_v19, %v1380_v18  ;;  %v1391_v32 = vadd.f32 %v1387_v19, %v1381_v20  ;;  %v1392_v33 = vadd.f32 %v1387_v19, %v1382_v24  ;;  %v1389_v34 = vadd.f32 %v1387_v19, %v1379_v25 }
 0x3c3   :  { %v4548_v37 = vmax.f32 %v1390_v30, 0.0  ;;  %v4550_v38 = vmax.f32 %v1391_v32, 0.0  ;;  %v4552_v45 = vmax.f32 %v1392_v33, 0.0  ;;  %v4554_v39 = vmax.f32 %v1389_v34, 0.0 }
 0x3c5   :  { %v1398_v47 = vrot.slane %v4548_v37, 7  ;;  %v1399_v43 = vrot.slane %v4550_v38, 7  ;;  %v1400_v3 = vrot.slane %v4552_v45, 7  ;;  %v1397_v40 = vrot.slane %v4554_v39, 7 }
 0x3c6   :  { %v2168_v49 = vrot.slane %v4554_v39, 1  ;;  %v2170_v50 = vrot.slane %v4550_v38, 1  ;;  %v2171_v51 = vrot.slane %v4552_v45, 1  ;;  %v2169_v52 = vrot.slane %v4548_v37, 1 }
 0x3c7   :  { %v1401_v4 = vsel %vm4795_vm0, %v1399_v43, %v1400_v3  ;;  %v1402_v5 = vsel %vm4796_vm3, %v1398_v47, %v1399_v43  ;;  %v1403_v41 = vsel %vm4797_vm15, %v1397_v40, %v1398_v47  ;;  %v1404_v42 = vsel %vm4798_vm1, %v1400_v3, %v1397_v40  ;;  %vm4801_vm0 = vmmov %vm4800_vm7  ;;  %v3848_v47 = vld [vmem:[#allocation2 + $0xf0] sm:$0xff]  }
 0x3c8   :  { %v3696_v26 = vpack.i.bf16 %v1401_v4, %v1402_v5  ;;  %v2949_v27 = vpack.c.bf16 %v1401_v4, %v1402_v5  ;;  %v3691_v46 = vpack.i.bf16 %v1403_v41, %v1404_v42  ;;  %v2945_v48 = vpack.c.bf16 %v1403_v41, %v1404_v42  ;;  %vm4802_vm3 = vmmov %vm4801_vm0 }
 0x3c9   :  { %v1916_v56 = vpack.c.bf16 %v4548_v37, %v4554_v39  ;;  %v1917_v57 = vpack.c.bf16 %v4552_v45, %v4550_v38  ;;  %v4587_v59 = vsel %vm4799_vm13, %v2170_v50, %v2171_v51  ;;  %v4591_v0 = vsel %vm4800_vm7, %v2171_v51, %v2168_v49  ;;  %v3860_v51 = vld [vmem:[#allocation2 + $0xc0] sm:$0xff]  }
 0x3ca   :  { %3697 = vrot.lane.b32.xlu1 %v3696_v26, %s3931_s20  ;;  %3692 = vrot.lane.b32.xlu0 %v3691_v46, %s3931_s20  ;;  %v4595_v60 = vsel %vm4801_vm0, %v2169_v52, %v2170_v50  ;;  %v4599_v23 = vsel %vm4802_vm3, %v2168_v49, %v2169_v52  ;;  %v3063_v53 = vpack.c.bf16 %v4591_v0, %v4587_v59  ;;  %v3856_v49 = vld [vmem:[#allocation2 + $0xd0] sm:$0xff]   ;;  %v3861_v52 = vld [vmem:[#allocation2 + $0x108] sm:$0xff]  }
 0x3cb   :  { %3459 = vmatprep.mubr.msk.bf16.mxu1 %vm4037_vm5, %v2945_v48  ;;  %v3059_v61 = vpack.c.bf16 %v4595_v60, %v4599_v23  ;;  %v3716_v35 = vpack.i.bf16 %v4552_v45, %v4550_v38  ;;  %v3711_v1 = vpack.i.bf16 %v4548_v37, %v4554_v39  ;;  %v3736_v11 = vpack.i.bf16 %v4591_v0, %v4587_v59  ;;  %v3851_v48 = vld [vmem:[#allocation2 + $0x130] sm:$0xff]   ;;  %v3857_v37 = vld [vmem:[#allocation2 + $0x118] sm:$0xff]   ;;  %v3858_v39 = vld [vmem:[#allocation2 + $0xc8] sm:$0xff]  }
 0x3cc   :  { %3460 = vmatmul.mubr.msk.bf16.vlgmr.msra.gmra.mxu1 %vm4130_vm8, %v2949_v27  ;;  %v3731_v12 = vpack.i.bf16 %v4595_v60, %v4599_v23  ;;  %v3859_v50 = vld [vmem:[#allocation2 + $0x110] sm:$0xff]   ;;  %vm4804_vm5 = vnez %v4776_v22  ;;  %v3873_v45 = vld [vmem:[#allocation2 + $0x198] sm:$0xff]   ;;  %v3874_v22 = vld [vmem:[#allocation2 + $0x148] sm:$0xff]   ;;  %vm4805_vm8 = vnez %v4784_v54 }
 0x3cd   :  { %3484 = vmatpush3.bf16.msra.mxu1 %v4530_v44  ;;  %v3839_v44 = vld [vmem:[#allocation2 + $0xa0] sm:$0xff]   ;;  %v3872_v38 = vld [vmem:[#allocation2 + $0x150] sm:$0xff]   ;;  %v3889_v23 = vld [vmem:[#allocation2 + $0x218] sm:$0xff]  }
 0x3ce   :  { %3707 = vrot.lane.b32.xlu1 %v3696_v26, %s3930_s19  ;;  %3702 = vrot.lane.b32.xlu0 %v3691_v46, %s3930_s19  ;;  %v3850_v26 = vld [vmem:[#allocation2 + $0xe8] sm:$0xff]   ;;  %v3887_v60 = vld [vmem:[#allocation2 + $0x220] sm:$0xff]   ;;  %v3888_v54 = vld [vmem:[#allocation2 + $0x1d0] sm:$0xff]  }
 0x3cf   :  { %3485 = vmatprep.subr.bf16.mxu1 %v3835_v58 }
 0x3d1   :  { %3486 = vmatpush3.bf16.msra.mxu1 %v3835_v58 }
 0x3d2   :  { %3717 = vrot.lane.b32.xlu1 %v3716_v35, %s3931_s20  ;;  %3712 = vrot.lane.b32.xlu0 %v3711_v1, %s3931_s20 }
 0x3d3   :  { %3487 = vmatprep.subr.bf16.mxu1 %v3837_v62 }
 0x3d5   :  { %3488 = vmatpush3.bf16.msra.mxu1 %v3837_v62 }
 0x3d6   :  { %3727 = vrot.lane.b32.xlu1 %v3716_v35, %s3930_s19  ;;  %3722 = vrot.lane.b32.xlu0 %v3711_v1, %s3930_s19  ;;  %v3862_v1 = vld [vmem:[#allocation2 + $0x100] sm:$0xff]  }
 0x3d7   :  { %3489 = vmatprep.subr.bf16.mxu1 %v3839_v44 }
 0x3d9   :  { %3490 = vmatpush3.bf16.msra.mxu1 %v3839_v44  ;;  %v3863_v44 = vld [vmem:[#allocation2 + $0x178] sm:$0xff]  }
 0x3da   :  { %3737 = vrot.lane.b32.xlu1 %v3736_v11, %s3931_s20  ;;  %3732 = vrot.lane.b32.xlu0 %v3731_v12, %s3931_s20 }
 0x3db   :  { %3491 = vmatprep.subr.bf16.mxu1 %v3841_v36 }
 0x3dd   :  { %3492 = vmatpush3.bf16.msra.mxu1 %v3841_v36 }
 0x3de   :  { %3747 = vrot.lane.b32.xlu1 %v3736_v11, %s3930_s19  ;;  %3742 = vrot.lane.b32.xlu0 %v3731_v12, %s3930_s19 }
 0x3df   :  { %3493 = vmatprep.subr.bf16.mxu1 %v3843_v13 }
 0x3e1   :  { %3494 = vmatpush3.bf16.msra.mxu1 %v3843_v13 }
 0x3e2   :  { %3495 = vmatprep.subr.bf16.mxu1 %v3845_v14 }
 0x3e5   :  { %3496 = vmatpush3.bf16.msra.mxu1 %v3845_v14  ;;  %v3864_v14 = vld [vmem:[#allocation2 + $0x170] sm:$0xff]  }
 0x3e6   :  { %3497 = vmatprep.subr.bf16.mxu1 %v3846_v15 }
 0x3e9   :  { %3498 = vmatpush3.bf16.msra.mxu1 %v3846_v15  ;;  %v3865_v15 = vld [vmem:[#allocation2 + $0x1b8] sm:$0xff]  }
 0x3ea   :  { %3523 = vmatprep.subr.bf16.mxu1 %v3849_v17 }
 0x43c   :  { %v3698_v18 = vpop.permute.xlu1 %3697  ;;  %v3693_v19 = vpop.permute.xlu0 %3692 }
 0x43d   :  { %v3700_v20 = vunpack.i.h.bf16 %v3698_v18  ;;  %v3699_v24 = vunpack.i.l.bf16 %v3698_v18  ;;  %v3695_v25 = vunpack.i.h.bf16 %v3693_v19  ;;  %v3694_v29 = vunpack.i.l.bf16 %v3693_v19 }
 0x43f   :  { %v2967_v30 = vpack.c.bf16 %v3700_v20, %v3699_v24  ;;  %v2962_v32 = vpack.c.bf16 %v3695_v25, %v3694_v29  ;;  %v3866_v20 = vld [vmem:[#allocation2 + $0x168] sm:$0xff]   ;;  %v3867_v24 = vld [vmem:[#allocation2 + $0x1b0] sm:$0xff]  }
 0x440   :  { %v3708_v33 = vpop.permute.xlu1 %3707  ;;  %v3703_v34 = vpop.permute.xlu0 %3702  ;;  %v3869_v29 = vld [vmem:[#allocation2 + $0x1a8] sm:$0xff]  }
 0x441   :  { %v3710_v43 = vunpack.i.h.bf16 %v3708_v33  ;;  %v3709_v3 = vunpack.i.l.bf16 %v3708_v33  ;;  %v3705_v40 = vunpack.i.h.bf16 %v3703_v34  ;;  %v3704_v4 = vunpack.i.l.bf16 %v3703_v34  ;;  %3479 = vmatprep.mubr.msk.bf16.mxu0 %vm4204_vm4, %v2962_v32  ;;  %v3871_v32 = vld [vmem:[#allocation2 + $0x1a0] sm:$0xff]  }
 0x442   :  { %3480 = vmatmul.mubr.msk.bf16.vlgmr.msra.gmra.mxu0 %vm4216_vm11, %v2967_v30  ;;  %vm4803_vm4 = vnez %v4768_v16  ;;  %v3868_v16 = vld [vmem:[#allocation2 + $0x160] sm:$0xff]   ;;  %v3870_v30 = vld [vmem:[#allocation2 + $0x158] sm:$0xff]  }
 0x443   :  { %v2985_v5 = vpack.c.bf16 %v3710_v43, %v3709_v3  ;;  %v2980_v41 = vpack.c.bf16 %v3705_v40, %v3704_v4  ;;  %3504 = vmatpush3.bf16.msra.mxu0 %v4556_v28  ;;  %v3853_v28 = vld [vmem:[#allocation2 + $0x128] sm:$0xff]   ;;  %v3876_v34 = vld [vmem:[#allocation2 + $0x140] sm:$0xff]   ;;  %v3879_v4 = vld [vmem:[#allocation2 + $0x1f8] sm:$0xff]  }
 0x444   :  { %v3713_v42 = vpop.permute.xlu0 %3712  ;;  %3505 = vmatprep.subr.bf16.mxu0 %v3848_v47  ;;  %v3878_v40 = vld [vmem:[#allocation2 + $0x180] sm:$0xff]  }
 0x445   :  { %v3715_v27 = vunpack.i.h.bf16 %v3713_v42  ;;  %v3714_v46 = vunpack.i.l.bf16 %v3713_v42  ;;  %3499 = vmatprep.mubr.msk.bf16.mxu1 %vm4210_vm6, %v2980_v41  ;;  %vm4806_vm6 = vnez %v4789_v63  ;;  %v3890_v63 = vld [vmem:[#allocation2 + $0x1c8] sm:$0xff]  }
 0x446   :  { %3500 = vmatmul.mubr.msk.bf16.vlgmr.msra.gmra.mxu1 %vm4222_vm12, %v2985_v5 }
 0x447   :  { %v2998_v6 = vpack.c.bf16 %v3715_v27, %v3714_v46  ;;  %3506 = vmatpush3.bf16.msra.mxu0 %v3848_v47  ;;  %3524 = vmatpush3.bf16.msra.mxu1 %v3849_v17  ;;  %v3877_v47 = vld [vmem:[#allocation2 + $0x188] sm:$0xff]   ;;  %v3880_v46 = vld [vmem:[#allocation2 + $0x1f0] sm:$0xff]  }
 0x448   :  { %3539 = vmatprep.mubr.bf16.mxu1 %v1916_v56  ;;  %3507 = vmatprep.subr.bf16.mxu0 %v3850_v26  ;;  %v3718_v56 = vpop.permute.xlu1 %3717  ;;  %v3723_v58 = vpop.permute.xlu0 %3722 }
 0x449   :  { %3519 = vmatprep.mubr.msk.bf16.mxu0 %vm4803_vm4, %v2998_v6  ;;  %3525 = vmatprep.subr.bf16.mxu1 %v3851_v48  ;;  %v3720_v62 = vunpack.i.h.bf16 %v3718_v56  ;;  %v3719_v35 = vunpack.i.l.bf16 %v3718_v56  ;;  %v3725_v36 = vunpack.i.h.bf16 %v3723_v58  ;;  %v3724_v11 = vunpack.i.l.bf16 %v3723_v58 }
 0x44b   :  { %3508 = vmatpush3.bf16.msra.mxu0 %v3850_v26  ;;  %3526 = vmatpush3.bf16.msra.mxu1 %v3851_v48  ;;  %v3003_v13 = vpack.c.bf16 %v3720_v62, %v3719_v35  ;;  %v3024_v17 = vpack.c.bf16 %v3725_v36, %v3724_v11  ;;  %v3881_v48 = vld [vmem:[#allocation2 + $0x238] sm:$0xff]  }
 0x44c   :  { %3509 = vmatprep.subr.bf16.mxu0 %v3852_v8  ;;  %3527 = vmatprep.subr.bf16.mxu1 %v3853_v28  ;;  %v3733_v12 = vpop.permute.xlu0 %3732  ;;  %v3728_v33 = vpop.permute.xlu1 %3727 }
 0x44d   :  { %v3735_v18 = vunpack.i.h.bf16 %v3733_v12  ;;  %v3734_v19 = vunpack.i.l.bf16 %v3733_v12  ;;  %v3730_v43 = vunpack.i.h.bf16 %v3728_v33  ;;  %v3729_v3 = vunpack.i.l.bf16 %v3728_v33 }
 0x44f   :  { %3510 = vmatpush3.bf16.msra.mxu0 %v3852_v8  ;;  %3528 = vmatpush3.bf16.msra.mxu1 %v3853_v28  ;;  %v3042_v25 = vpack.c.bf16 %v3735_v18, %v3734_v19  ;;  %v3029_v42 = vpack.c.bf16 %v3730_v43, %v3729_v3 }
 0x450   :  { %3511 = vmatprep.subr.bf16.mxu0 %v3854_v7  ;;  %3529 = vmatprep.subr.bf16.mxu1 %v3855_v9  ;;  %v3738_v5 = vpop.permute.xlu1 %3737  ;;  %v3743_v41 = vpop.permute.xlu0 %3742 }
 0x451   :  { %v3740_v26 = vunpack.i.h.bf16 %v3738_v5  ;;  %v3739_v27 = vunpack.i.l.bf16 %v3738_v5  ;;  %v3745_v6 = vunpack.i.h.bf16 %v3743_v41  ;;  %v3744_v8 = vunpack.i.l.bf16 %v3743_v41 }
 0x453   :  { %3512 = vmatpush3.bf16.msra.mxu0 %v3854_v7  ;;  %3530 = vmatpush3.bf16.msra.mxu1 %v3855_v9  ;;  %v3047_v28 = vpack.c.bf16 %v3740_v26, %v3739_v27  ;;  %v3882_v7 = vld [vmem:[#allocation2 + $0x1e8] sm:$0xff]   ;;  %v3883_v9 = vld [vmem:[#allocation2 + $0x230] sm:$0xff]  }
 0x454   :  { %3513 = vmatprep.subr.bf16.mxu0 %v3856_v49  ;;  %3531 = vmatprep.subr.bf16.mxu1 %v3857_v37 }
 0x457   :  { %3514 = vmatpush3.bf16.msra.mxu0 %v3856_v49  ;;  %3532 = vmatpush3.bf16.msra.mxu1 %v3857_v37  ;;  %v3076_v49 = vpack.c.bf16 %v3745_v6, %v3744_v8  ;;  %v3885_v37 = vld [vmem:[#allocation2 + $0x228] sm:$0xff]  }
 0x458   :  { %3515 = vmatprep.subr.bf16.mxu0 %v3858_v39  ;;  %3533 = vmatprep.subr.bf16.mxu1 %v3859_v50 }
 0x45b   :  { %3516 = vmatpush3.bf16.msra.mxu0 %v3858_v39  ;;  %3534 = vmatpush3.bf16.msra.mxu1 %v3859_v50  ;;  %v3892_v39 = vld [vmem:[#allocation2 + $0x1c0] sm:$0xff]   ;;  %v3893_v50 = vld [vmem:[#allocation2 + $0x208] sm:$0xff]  }
 0x45c   :  { %3517 = vmatprep.subr.bf16.mxu0 %v3860_v51  ;;  %3535 = vmatprep.subr.bf16.mxu1 %v3861_v52 }
 0x45f   :  { %3518 = vmatpush3.bf16.msra.mxu0 %v3860_v51  ;;  %3536 = vmatpush3.bf16.msra.mxu1 %v3861_v52  ;;  %v3894_v51 = vld [vmem:[#allocation2 + $0x200] sm:$0xff]   ;;  %v3748_v52 = vpop.permute.xlu1 %3747 }
 0x460   :  { %3537 = vmatprep.subr.bf16.mxu1 %v3862_v1  ;;  %3543 = vmatprep.subr.bf16.mxu0 %v3863_v44  ;;  %v3750_v56 = vunpack.i.h.bf16 %v3748_v52  ;;  %v3749_v58 = vunpack.i.l.bf16 %v3748_v52 }
 0x462   :  { %3520 = vmatmul.mubr.msk.bf16.vlgmr.msra.gmra.mxu0 %vm4803_vm4, %v3003_v13  ;;  %v3081_v62 = vpack.c.bf16 %v3750_v56, %v3749_v58 }
 0x463   :  { %3538 = vmatpush3.bf16.msra.mxu1 %v3862_v1  ;;  %3544 = vmatpush3.bf16.msra.mxu0 %v3863_v44 }
 0x464   :  { %3559 = vmatprep.mubr.msk.bf16.mxu0 %vm4324_vm2, %v3024_v17  ;;  %3545 = vmatprep.subr.bf16.mxu0 %v3864_v14 }
 0x465   :  { %3563 = vmatprep.subr.bf16.mxu1 %v3865_v15 }
 0x466   :  { %3540 = vmatmul.mubr.bf16.vlgmr.msra.gmra.mxu1 %v1917_v57  ;;  %v3875_v57 = vld [vmem:[#allocation2 + $0x190] sm:$0xff]  }
 0x467   :  { %3546 = vmatpush3.bf16.msra.mxu0 %v3864_v14  ;;  %3564 = vmatpush3.bf16.msra.mxu1 %v3865_v15 }
 0x468   :  { %3579 = vmatprep.mubr.msk.bf16.mxu1 %vm4804_vm5, %v3042_v25  ;;  %3547 = vmatprep.subr.bf16.mxu0 %v3866_v20 }
 0x469   :  { %3565 = vmatprep.subr.bf16.mxu1 %v3867_v24 }
 0x46b   :  { %3548 = vmatpush3.bf16.msra.mxu0 %v3866_v20  ;;  %3566 = vmatpush3.bf16.msra.mxu1 %v3867_v24 }
 0x46c   :  { %3549 = vmatprep.subr.bf16.mxu0 %v3868_v16  ;;  %3567 = vmatprep.subr.bf16.mxu1 %v3869_v29 }
 0x46f   :  { %3550 = vmatpush3.bf16.msra.mxu0 %v3868_v16  ;;  %3568 = vmatpush3.bf16.msra.mxu1 %v3869_v29 }
 0x470   :  { %3551 = vmatprep.subr.bf16.mxu0 %v3870_v30  ;;  %3569 = vmatprep.subr.bf16.mxu1 %v3871_v32 }
 0x473   :  { %3552 = vmatpush3.bf16.msra.mxu0 %v3870_v30  ;;  %3570 = vmatpush3.bf16.msra.mxu1 %v3871_v32 }
 0x474   :  { %3553 = vmatprep.subr.bf16.mxu0 %v3872_v38  ;;  %3571 = vmatprep.subr.bf16.mxu1 %v3873_v45 }
 0x477   :  { %3554 = vmatpush3.bf16.msra.mxu0 %v3872_v38  ;;  %3572 = vmatpush3.bf16.msra.mxu1 %v3873_v45 }
 0x478   :  { %3555 = vmatprep.subr.bf16.mxu0 %v3874_v22  ;;  %3573 = vmatprep.subr.bf16.mxu1 %v3875_v57 }
 0x47b   :  { %3556 = vmatpush3.bf16.msra.mxu0 %v3874_v22  ;;  %3574 = vmatpush3.bf16.msra.mxu1 %v3875_v57 }
 0x47c   :  { %3557 = vmatprep.subr.bf16.mxu0 %v3876_v34  ;;  %3575 = vmatprep.subr.bf16.mxu1 %v3877_v47 }
 0x47f   :  { %3558 = vmatpush3.bf16.msra.mxu0 %v3876_v34  ;;  %3576 = vmatpush3.bf16.msra.mxu1 %v3877_v47 }
 0x480   :  { %3577 = vmatprep.subr.bf16.mxu1 %v3878_v40  ;;  %3583 = vmatprep.subr.bf16.mxu0 %v3879_v4 }
 0x482   :  { %3560 = vmatmul.mubr.msk.bf16.vlgmr.msra.gmra.mxu0 %vm4324_vm2, %v3029_v42 }
 0x483   :  { %3578 = vmatpush3.bf16.msra.mxu1 %v3878_v40  ;;  %3584 = vmatpush3.bf16.msra.mxu0 %v3879_v4 }
 0x484   :  { %3599 = vmatprep.mubr.msk.bf16.mxu0 %vm4422_vm9, %v3059_v61  ;;  %3585 = vmatprep.subr.bf16.mxu0 %v3880_v46  ;;  %v3891_v61 = vld [vmem:[#allocation2 + $0x210] sm:$0xff]  }
 0x485   :  { %3603 = vmatprep.subr.bf16.mxu1 %v3881_v48 }
 0x486   :  { %3580 = vmatmul.mubr.msk.bf16.vlgmr.msra.gmra.mxu1 %vm4805_vm8, %v3047_v28 }
 0x487   :  { %3586 = vmatpush3.bf16.msra.mxu0 %v3880_v46  ;;  %3604 = vmatpush3.bf16.msra.mxu1 %v3881_v48 }
 0x488   :  { %3619 = vmatprep.mubr.msk.bf16.mxu1 %vm4806_vm6, %v3076_v49  ;;  %3587 = vmatprep.subr.bf16.mxu0 %v3882_v7 }
 0x489   :  { %3605 = vmatprep.subr.bf16.mxu1 %v3883_v9 }
 0x48b   :  { %3588 = vmatpush3.bf16.msra.mxu0 %v3882_v7  ;;  %3606 = vmatpush3.bf16.msra.mxu1 %v3883_v9 }
 0x48c   :  { %3589 = vmatprep.subr.bf16.mxu0 %v3884_v21  ;;  %3607 = vmatprep.subr.bf16.mxu1 %v3885_v37  ;;  %v3461_v35 = vpop.f32.mrf.mxu1 }
 0x48e   :  { %v1540_v1 = vpop.f32.mrf.mxu1 }
 0x48f   :  { %3590 = vmatpush3.bf16.msra.mxu0 %v3884_v21  ;;  %3608 = vmatpush3.bf16.msra.mxu1 %v3885_v37 }
 0x490   :  { %3591 = vmatprep.subr.bf16.mxu0 %v3886_v55  ;;  %3609 = vmatprep.subr.bf16.mxu1 %v3887_v60  ;;  %v3462_v44 = vpop.f32.mrf.mxu1 }
 0x492   :  { %v1543_v11 = vpop.f32.mrf.mxu1 }
 0x493   :  { %3592 = vmatpush3.bf16.msra.mxu0 %v3886_v55  ;;  %3610 = vmatpush3.bf16.msra.mxu1 %v3887_v60 }
 0x494   :  { %3593 = vmatprep.subr.bf16.mxu0 %v3888_v54  ;;  %3611 = vmatprep.subr.bf16.mxu1 %v3889_v23 }
 0x497   :  { %3594 = vmatpush3.bf16.msra.mxu0 %v3888_v54  ;;  %3612 = vmatpush3.bf16.msra.mxu1 %v3889_v23 }
 0x498   :  { %3595 = vmatprep.subr.bf16.mxu0 %v3890_v63  ;;  %3613 = vmatprep.subr.bf16.mxu1 %v3891_v61 }
 0x49b   :  { %3596 = vmatpush3.bf16.msra.mxu0 %v3890_v63  ;;  %3614 = vmatpush3.bf16.msra.mxu1 %v3891_v61 }
 0x49c   :  { %3597 = vmatprep.subr.bf16.mxu0 %v3892_v39  ;;  %3615 = vmatprep.subr.bf16.mxu1 %v3893_v50 }
 0x49f   :  { %3598 = vmatpush3.bf16.msra.mxu0 %v3892_v39  ;;  %3616 = vmatpush3.bf16.msra.mxu1 %v3893_v50 }
 0x4a0   :  { %3617 = vmatprep.subr.bf16.mxu1 %v3894_v51 }
 0x4a2   :  { %3600 = vmatmul.mubr.msk.bf16.vlgmr.msra.gmra.mxu0 %vm4485_vm14, %v3063_v53 }
 0x4a3   :  { %3618 = vmatpush3.bf16.msra.mxu1 %v3894_v51 }
 0x4a6   :  { %3620 = vmatmul.mubr.msk.bf16.vlgmr.msra.gmra.mxu1 %vm4491_vm10, %v3081_v62 }
 0x502   :  { %v3481_v36 = vpop.f32.mrf.mxu0 }
 0x503   :  { %v1646_v22 = vadd.f32 %v3481_v36, %v3461_v35 }
 0x504   :  { %v1637_v12 = vpop.f32.mrf.mxu0 }
 0x505   :  { %v1638_v45 = vadd.f32 %v1637_v12, %v1540_v1 }
 0x506   :  { %v3501_v13 = vpop.f32.mrf.mxu1  ;;  %v3482_v14 = vpop.f32.mrf.mxu0 }
 0x507   :  { %v1649_v43 = vadd.f32 %v3482_v14, %v3462_v44  ;;  %v1782_v3 = vadd.f32 %v3501_v13, %v1646_v22 }
 0x508   :  { %v1765_v15 = vpop.f32.mrf.mxu1  ;;  %v1640_v17 = vpop.f32.mrf.mxu0 }
 0x509   :  { %v1641_v57 = vadd.f32 %v1640_v17, %v1543_v11  ;;  %v1780_v33 = vadd.f32 %v1765_v15, %v1638_v45 }
 0x50a   :  { %v3502_v18 = vpop.f32.mrf.mxu1 }
 0x50b   :  { %v1783_v41 = vadd.f32 %v3502_v18, %v1649_v43 }
 0x50c   :  { %v1768_v0 = vpop.f32.mrf.mxu1 }
 0x50d   :  { %v1781_v40 = vadd.f32 %v1768_v0, %v1641_v57 }
 0x522   :  { %v3521_v59 = vpop.f32.mrf.mxu0 }
 0x523   :  { %v1914_v42 = vadd.f32 %v3521_v59, %v1782_v3 }
 0x524   :  { %v1897_v31 = vpop.f32.mrf.mxu0 }
 0x525   :  { %v1912_v4 = vadd.f32 %v1897_v31, %v1780_v33 }
 0x526   :  { %v3541_v53 = vpop.f32.mrf.mxu1  ;;  %v3522_v19 = vpop.f32.mrf.mxu0 }
 0x527   :  { %v1915_v6 = vadd.f32 %v3522_v19, %v1783_v41  ;;  %v2034_v8 = vadd.f32 %v3541_v53, %v1914_v42 }
 0x528   :  { %v2017_v20 = vpop.f32.mrf.mxu1  ;;  %v1900_v24 = vpop.f32.mrf.mxu0 }
 0x529   :  { %v1913_v26 = vadd.f32 %v1900_v24, %v1781_v40  ;;  %v2032_v27 = vadd.f32 %v2017_v20, %v1912_v4 }
 0x52a   :  { %v3542_v2 = vpop.f32.mrf.mxu1 }
 0x52b   :  { %v2035_v21 = vadd.f32 %v3542_v2, %v1915_v6 }
 0x52c   :  { %v2020_v16 = vpop.f32.mrf.mxu1 }
 0x52d   :  { %v2033_v28 = vadd.f32 %v2020_v16, %v1913_v26 }
 0x542   :  { %v3561_v25 = vpop.f32.mrf.mxu0 }
 0x543   :  { %v2166_v37 = vadd.f32 %v3561_v25, %v2034_v8 }
 0x544   :  { %v2149_v29 = vpop.f32.mrf.mxu0 }
 0x545   :  { %v2164_v7 = vadd.f32 %v2149_v29, %v2032_v27 }
 0x546   :  { %v3581_v30 = vpop.f32.mrf.mxu1  ;;  %v3562_v32 = vpop.f32.mrf.mxu0 }
 0x547   :  { %v2167_v63 = vadd.f32 %v3562_v32, %v2035_v21  ;;  %v2306_v61 = vadd.f32 %v3581_v30, %v2166_v37  ;;  %v2564_v37 = vld [vmem:[%s4734_s5] sm:$0x1] }
 0x548   :  { %v2289_v38 = vpop.f32.mrf.mxu1  ;;  %v2152_v34 = vpop.f32.mrf.mxu0 }
 0x549   :  { %v2165_v55 = vadd.f32 %v2152_v34, %v2033_v28  ;;  %v2304_v60 = vadd.f32 %v2289_v38, %v2164_v7 }
 0x54a   :  { %v3582_v47 = vpop.f32.mrf.mxu1 }
 0x54b   :  { %v2307_v52 = vadd.f32 %v3582_v47, %v2167_v63 }
 0x54c   :  { %v2292_v46 = vpop.f32.mrf.mxu1 }
 0x54d   :  { %v2305_v39 = vadd.f32 %v2292_v46, %v2165_v55 }
 0x562   :  { %v3601_v5 = vpop.f32.mrf.mxu0 }
 0x563   :  { %v2430_v56 = vadd.f32 %v3601_v5, %v2306_v61 }
 0x564   :  { %v2413_v48 = vpop.f32.mrf.mxu0 }
 0x565   :  { %v2428_v50 = vadd.f32 %v2413_v48, %v2304_v60 }
 0x566   :  { %v3602_v9 = vpop.f32.mrf.mxu0  ;;  %v3621_v49 = vpop.f32.mrf.mxu1 }
 0x567   :  { %v2431_v1 = vadd.f32 %v3602_v9, %v2307_v52  ;;  %v4667_v44 = vadd.f32 %v3621_v49, %v2430_v56 }
 0x568   :  { %v2416_v54 = vpop.f32.mrf.mxu0  ;;  %v2545_v23 = vpop.f32.mrf.mxu1 }
 0x569   :  { %v2429_v58 = vadd.f32 %v2416_v54, %v2305_v39  ;;  %v4665_v62 = vadd.f32 %v2545_v23, %v2428_v50  ;;  %v2577_v15 = vmul.f32 %v4667_v44, %v4667_v44  ;;  %v2565_v54 = vld [vmem:[%s4735_s6] sm:$0x1] }
 0x56a   :  { %v3622_v51 = vpop.f32.mrf.mxu1 }
 0x56b   :  { %v2575_v11 = vmul.f32 %v4665_v62, %v4665_v62  ;;  %v4673_v12 = vadd.f32 %v3622_v51, %v2431_v1 }
 0x56c   :  { %v2548_v35 = vpop.f32.mrf.mxu1 }
 0x56d   :  { %v4669_v36 = vadd.f32 %v2548_v35, %v2429_v58  ;;  %v2578_v59 = vmul.f32 %v4673_v12, %v4673_v12 }
 0x56f   :  { %v2566_v13 = vadd.f32 %v4669_v36, %v4665_v62  ;;  %v2576_v14 = vmul.f32 %v4669_v36, %v4669_v36 }
 0x571   :  { %v2567_v17 = vadd.f32 %v2566_v13, %v4667_v44  ;;  %v2579_v18 = vadd.f32 %v2576_v14, %v2575_v11  ;;  %v3901_v13 = vld [vmem:[%s4729_s0] sm:$0xff] }
 0x573   :  { %v2568_v0 = vadd.f32 %v2567_v17, %v4673_v12  ;;  %v2580_v31 = vadd.f32 %v2579_v18, %v2577_v15 }
 0x575   :  { %v2569_v53 = vrot.slane %v2568_v0, 4  ;;  %v2581_v19 = vadd.f32 %v2580_v31, %v2578_v59 }
 0x577   :  { %v2570_v20 = vadd.f32 %v2569_v53, %v2568_v0  ;;  %v2582_v24 = vrot.slane %v2581_v19, 4 }
 0x579   :  { %v2571_v2 = vrot.slane %v2570_v20, 2  ;;  %v2583_v25 = vadd.f32 %v2582_v24, %v2581_v19 }
 0x57b   :  { %v2572_v16 = vadd.f32 %v2571_v2, %v2570_v20  ;;  %v2584_v29 = vrot.slane %v2583_v25, 2 }
 0x57d   :  { %v2573_v30 = vrot.slane %v2572_v16, 1  ;;  %v2585_v32 = vadd.f32 %v2584_v29, %v2583_v25 }
 0x57f   :  { %v2574_v38 = vadd.f32 %v2573_v30, %v2572_v16  ;;  %v2586_v45 = vrot.slane %v2585_v32, 1 }
 0x581   :  { %2588 = vrot.lane.b32.xlu0 %v2574_v38, %s3931_s20  ;;  %v2587_v22 = vadd.f32 %v2586_v45, %v2585_v32 }
 0x583   :  { %2601 = vrot.lane.b32.xlu1 %v2587_v22, %s3931_s20 }
 0x5f3   :  { %v2589_v57 = vpop.permute.xlu0 %2588 }
 0x5f4   :  { %v2590_v33 = vadd.f32 %v2589_v57, %v2574_v38 }
 0x5f5   :  { %v2602_v34 = vpop.permute.xlu1 %2601 }
 0x5f6   :  { %v2603_v47 = vadd.f32 %v2602_v34, %v2587_v22  ;;  %2591 = vrot.lane.b32.xlu0 %v2590_v33, %s3933_s1 }
 0x5f8   :  { %2604 = vrot.lane.b32.xlu1 %v2603_v47, %s3933_s1 }
 0x668   :  { %v2592_v43 = vpop.permute.xlu0 %2591 }
 0x669   :  { %v2593_v3 = vadd.f32 %v2592_v43, %v2590_v33 }
 0x66a   :  { %v2605_v40 = vpop.permute.xlu1 %2604 }
 0x66b   :  { %v2606_v4 = vadd.f32 %v2605_v40, %v2603_v47  ;;  %2594 = vrot.lane.b32.xlu0 %v2593_v3, %s3934_s16 }
 0x66d   :  { %2607 = vrot.lane.b32.xlu1 %v2606_v4, %s3934_s16 }
 0x6dd   :  { %v2595_v5 = vpop.permute.xlu0 %2594 }
 0x6de   :  { %v2596_v41 = vadd.f32 %v2595_v5, %v2593_v3 }
 0x6df   :  { %v2608_v42 = vpop.permute.xlu1 %2607 }
 0x6e0   :  { %v2609_v26 = vadd.f32 %v2608_v42, %v2606_v4  ;;  %2597 = vrot.lane.b32.xlu0 %v2596_v41, %s3928_s27 }
 0x6e2   :  { %2610 = vrot.lane.b32.xlu1 %v2609_v26, %s3928_s27 }
 0x752   :  { %v2598_v27 = vpop.permute.xlu0 %2597 }
 0x753   :  { %v2599_v46 = vadd.f32 %v2598_v27, %v2596_v41 }
 0x754   :  { %v2611_v48 = vpop.permute.xlu1 %2610 }
 0x755   :  { %v2600_v6 = vmul.f32 0.001953125, %v2599_v46  ;;  %v2612_v8 = vadd.f32 %v2611_v48, %v2609_v26 }
 0x757   :  { %v2614_v28 = vmul.f32 %v2600_v6, %v2600_v6  ;;  %v2613_v7 = vmul.f32 0.001953125, %v2612_v8 }
 0x759   :  { %v2615_v9 = vsub.f32 %v2613_v7, %v2614_v28 }
 0x75b   :  { %v2616_v49 = vmax.f32 %v2615_v9, 0.0 }
 0x75d   :  { %v2617_v21 = vadd.f32 1e-05, %v2616_v49 }
 0x75f   :  { %3897 = vrsqrt.f32 %v2617_v21 }
 0x76c   :  { %v3898_v55 = vpop.eup %3897 }
 0x76d   :  { %v2619_v60 = vmul.f32 %v3898_v55, %v2564_v37 }
 0x76f   :  { %v2620_v23 = vmul.f32 %v2619_v60, %v2600_v6  ;;  %v2626_v63 = vrot.slane %v2619_v60, %v4537_v10 }
 0x771   :  { %v2621_v61 = vsub.f32 %v2565_v54, %v2620_v23  ;;  %v2628_v39 = vmul.f32 %v2626_v63, %v4665_v62  ;;  %v2629_v50 = vmul.f32 %v2626_v63, %v4669_v36  ;;  %v2630_v51 = vmul.f32 %v2626_v63, %v4667_v44  ;;  %v3902_v62 = vld [vmem:[%s4729_s0 + $0x8] sm:$0xff]  ;;  %v3903_v44 = vld [vmem:[%s4729_s0 + $0x10] sm:$0xff] }
 0x772   :  { %v2631_v52 = vmul.f32 %v2626_v63, %v4673_v12 }
 0x773   :  { %v2636_v56 = vrot.slane %v2621_v61, %v4537_v10  ;;  %v3904_v10 = vld [vmem:[%s4729_s0 + $0x18] sm:$0xff] }
 0x775   :  { %v2638_v58 = vadd.f32 %v2636_v56, %v2628_v39  ;;  %v2639_v35 = vadd.f32 %v2636_v56, %v2629_v50  ;;  %v2640_v1 = vadd.f32 %v2636_v56, %v2630_v51  ;;  %v2641_v11 = vadd.f32 %v2636_v56, %v2631_v52 }
 0x777   :  { %v2642_v14 = vadd.f32 %v3901_v13, %v2638_v58  ;;  %v2643_v36 = vadd.f32 %v3902_v62, %v2639_v35  ;;  %v2644_v12 = vadd.f32 %v3903_v44, %v2640_v1  ;;  %v2645_v15 = vadd.f32 %v3904_v10, %v2641_v11 }
 0x779   :  { %v2646_v17 = vmax.f32 %v2642_v14, 0.0  ;;  %v2647_v18 = vmax.f32 %v2643_v36, 0.0  ;;  %v2648_v59 = vmax.f32 %v2644_v12, 0.0  ;;  %v2649_v0 = vmax.f32 %v2645_v15, 0.0 }
 0x77b   :  { %2650 = vst [vmem:[%s4736_s7] sm:$0xff] %v2646_v17  ;;  %2651 = vst [vmem:[%s4736_s7 + $0x8] sm:$0xff] %v2647_v18 }
 0x77c   :  { %2652 = vst [vmem:[%s4736_s7 + $0x10] sm:$0xff] %v2648_v59  ;;  %2653 = vst [vmem:[%s4736_s7 + $0x18] sm:$0xff] %v2649_v0 }
 0x77d   :  { %2658 = vsyncpa [#allocation3], 1 }

</bundles_post_ra>
